<compile_context>
chip_gen: v7x
topology: tpu7x:2x2x1
jax: 0.10.0
libtpu: 0.0.40
codegen_flags: <defaults>
</compile_context>

<pallas_src>
import functools

import jax
import jax.numpy as jnp
from jax import lax
from jax.experimental import pallas as pl
from jax.experimental.pallas import tpu as pltpu


def _dwconv_kernel(x_ref, w_ref, b_ref, o_ref, xpad_ref, *, band_h):
    # x_ref:    (1, H, W, Ct)      unpadded input block (one batch elem, one channel tile)
    # w_ref:    (3, 3, Ct)         depthwise filter taps for this channel tile
    # b_ref:    (1, Ct)            bias for this channel tile
    # o_ref:    (1, H, W, Ct)      output block
    # xpad_ref: (H+2, W+2, Ct)     VMEM scratch holding the zero-padded tile
    H = o_ref.shape[1]
    W = o_ref.shape[2]
    Ct = o_ref.shape[3]
    dt = xpad_ref.dtype

    # --- Build the zero-padded tile in VMEM ---------------------------------
    # Only the 1-pixel halo needs explicit zeros; the interior is fully
    # overwritten by the copy below.  Re-zero the border every step (cheap,
    # and safe under megacore grid sharding / arbitrary iteration order).
    zero_row = jnp.zeros((1, W + 2, Ct), dtype=dt)
    xpad_ref[pl.ds(0, 1), :, :] = zero_row
    xpad_ref[pl.ds(H + 1, 1), :, :] = zero_row
    zero_col = jnp.zeros((H, 1, Ct), dtype=dt)
    xpad_ref[pl.ds(1, H), pl.ds(0, 1), :] = zero_col
    xpad_ref[pl.ds(1, H), pl.ds(W + 1, 1), :] = zero_col
    # Interior copy (VMEM -> VMEM); the activation itself hit HBM exactly once.
    xpad_ref[pl.ds(1, H), pl.ds(1, W), :] = x_ref[0]

    w = w_ref[...].astype(jnp.float32)        # (3, 3, Ct), hoisted out of the loops
    bias = b_ref[0, :].astype(jnp.float32)    # (Ct,)

    n_bands = H // band_h

    def band_body(i, carry):
        h0 = pl.multiple_of(i * band_h, band_h)
        # Bias folded into the accumulator init (saves a full-tile add).
        acc = jnp.broadcast_to(bias, (band_h, W, Ct)).astype(jnp.float32)
        # 9 shifted elementwise multiply-accumulates (pure VPU work; channels never mix).
        for dh in range(3):
            for dw in range(3):
                patch = xpad_ref[pl.ds(h0 + dh, band_h), pl.ds(dw, W), :].astype(jnp.float32)
                acc = acc + patch * w[dh, dw]  # (Ct,) tap broadcasts over (band_h, W, Ct)
        o_ref[0, pl.ds(h0, band_h), :, :] = acc.astype(o_ref.dtype)
        return carry

    # Unroll short band loops for LLO scheduling visibility; keep long ones rolled.
    lax.fori_loop(0, n_bands, band_body, 0, unroll=(n_bands <= 8))


def _block_vmem_bytes(height, width, ct, itemsize):
    io_block = height * width * ct * itemsize          # one input or output block
    pad_scratch = (height + 2) * (width + 2) * ct * itemsize
    wgt_block = (9 + 1) * ct * 4                       # weight + bias blocks (f32 upper bound)
    # 2x for double buffering on pipelined in/out/weight blocks; scratch is single.
    return 2 * (2 * io_block + wgt_block) + pad_scratch


def _pick_channel_tile(C, height, width, itemsize, budget_bytes):
    # Channel tiles must be lane-legal: a multiple of 128, or the full C dimension.
    lane_divs = [d for d in range(C, 0, -1) if C % d == 0 and d % 128 == 0]
    for d in lane_divs:
        if _block_vmem_bytes(height, width, d, itemsize) <= budget_bytes:
            return d
    if lane_divs:
        return lane_divs[-1]   # smallest 128-multiple divisor
    return C                   # C not a multiple of 128: full-dim block is still legal


def segformer_dwconv(hidden_states, height, width, weight, bias, *,
                     channel_tile=None, vmem_budget_bytes=20 * 1024 * 1024):
    """hidden_states: (B, seq_len, C); weight: (3, 3, C) (PyTorch weight[:, 0].permute(1, 2, 0));
    bias: (C,). Returns (B, H*W, C), matching SegformerDWConv.forward."""
    B, seq_len, C = hidden_states.shape
    assert seq_len == height * width

    itemsize = jnp.dtype(hidden_states.dtype).itemsize

    if channel_tile is None:
        ct = _pick_channel_tile(C, height, width, itemsize, vmem_budget_bytes)
    else:
        ct = channel_tile
        assert C % ct == 0 and (ct % 128 == 0 or ct == C), "channel_tile must be lane-legal"
    n_ct = C // ct

    band_h = next(d for d in (8, 4, 2, 1) if height % d == 0)

    # (B, seq, C) -> (B, H, W, C): pure reshape, no HBM shuffle (C stays innermost).
    x = hidden_states.reshape(B, height, width, C)
    bias2d = bias.reshape(1, C)

    needed = _block_vmem_bytes(height, width, ct, itemsize)
    vmem_limit = int(min(max(needed + (4 << 20), 32 << 20), 48 << 20))

    cost = pl.CostEstimate(
        flops=18 * B * height * width * C,
        transcendentals=0,
        bytes_accessed=2 * B * height * width * C * itemsize,
    )

    kernel = functools.partial(_dwconv_kernel, band_h=band_h)

    out = pl.pallas_call(
        kernel,
        out_shape=jax.ShapeDtypeStruct((B, height, width, C), hidden_states.dtype),
        grid_spec=pltpu.PrefetchScalarGridSpec(
            num_scalar_prefetch=0,
            grid=(B, n_ct),
            in_specs=[
                pl.BlockSpec((1, height, width, ct), lambda b, c: (b, 0, 0, c)),
                pl.BlockSpec((3, 3, ct), lambda b, c: (0, 0, c)),
                pl.BlockSpec((1, ct), lambda b, c: (0, c)),
            ],
            out_specs=pl.BlockSpec((1, height, width, ct), lambda b, c: (b, 0, 0, c)),
            scratch_shapes=[
                pltpu.VMEM((height + 2, width + 2, ct), hidden_states.dtype),
            ],
        ),
        compiler_params=pltpu.CompilerParams(
            dimension_semantics=("parallel", "parallel"),
            vmem_limit_bytes=vmem_limit,
        ),
        cost_estimate=cost,
    )(x, weight, bias2d)

    return out.reshape(B, height * width, C)


def _reference_dwconv(hidden_states, height, width, weight, bias):
    """Pure-JAX reference using lax.conv_general_dilated (depthwise)."""
    B, seq_len, C = hidden_states.shape
    x = hidden_states.reshape(B, height, width, C)
    w = weight.reshape(3, 3, 1, C)  # HWIO with feature_group_count=C
    y = lax.conv_general_dilated(
        x, w, window_strides=(1, 1), padding=((1, 1), (1, 1)),
        dimension_numbers=("NHWC", "HWIO", "NHWC"),
        feature_group_count=C,
        precision=lax.Precision.HIGHEST,
    )
    y = y + bias.reshape(1, 1, 1, C)
    return y.reshape(B, height * width, C)


if __name__ == "__main__":
    key = jax.random.PRNGKey(0)
    k_x, k_w, k_b, k_x2, k_w2, k_b2 = jax.random.split(key, 6)

    # Case 1: small shapes, single channel tile (C < 128), band loop of 2 bands.
    B, H, W, C = 2, 16, 16, 32
    hidden_states = jax.random.normal(k_x, (B, H * W, C), dtype=jnp.float32)
    weight = jax.random.normal(k_w, (3, 3, C), dtype=jnp.float32) * 0.1
    bias = jax.random.normal(k_b, (C,), dtype=jnp.float32) * 0.1

    out = segformer_dwconv(hidden_states, H, W, weight, bias)
    out = jax.block_until_ready(out)
    ref = _reference_dwconv(hidden_states, H, W, weight, bias)
    assert out.shape == (B, H * W, C)
    assert jnp.allclose(out, ref, atol=1e-4, rtol=1e-4)

    # Case 2: exercise lane-aligned channel tiling (C=256 split into two 128-wide tiles),
    # which also gives v7x's second TensorCore work at batch 1.
    B2, H2, W2, C2 = 1, 8, 8, 256
    hs2 = jax.random.normal(k_x2, (B2, H2 * W2, C2), dtype=jnp.float32)
    w2 = jax.random.normal(k_w2, (3, 3, C2), dtype=jnp.float32) * 0.1
    b2 = jax.random.normal(k_b2, (C2,), dtype=jnp.float32) * 0.1

    out2 = segformer_dwconv(hs2, H2, W2, w2, b2, channel_tile=128)
    out2 = jax.block_until_ready(out2)
    ref2 = _reference_dwconv(hs2, H2, W2, w2, b2)
    assert jnp.allclose(out2, ref2, atol=1e-4, rtol=1e-4)

    print("KERNEL_OK")
</pallas_src>

<mosaic_0001>
module attributes {stable_mosaic.version = 11 : i64} {
  func.func @_dwconv_kernel(%arg0: i32, %arg1: i32, %arg2: memref<1x16x16x32xf32, #tpu.memory_space<vmem>>, %arg3: memref<3x3x32xf32, #tpu.memory_space<vmem>>, %arg4: memref<1x32xf32, #tpu.memory_space<vmem>>, %arg5: memref<1x16x16x32xf32, #tpu.memory_space<vmem>>, %arg6: memref<18x18x32xf32, #tpu.memory_space<vmem>>) attributes {dimension_semantics = [#tpu.dimension_semantics<parallel>, #tpu.dimension_semantics<parallel>], iteration_bounds = array<i64: 2, 1>, scalar_prefetch = 0 : i64, scratch_operands = 1 : i64, tpu.core_type = #tpu.core_type<tc>, window_params = [{transform_indices = @transform_0, window_bounds = array<i64: 1, 16, 16, 32>}, {transform_indices = @transform_1, window_bounds = array<i64: 3, 3, 32>}, {transform_indices = @transform_2, window_bounds = array<i64: 1, 32>}, {transform_indices = @transform_3, window_bounds = array<i64: 1, 16, 16, 32>}]} {
    %cst = arith.constant 0.000000e+00 : f32
    %0 = vector.broadcast %cst : f32 to vector<1x18x32xf32>
    %c0 = arith.constant 0 : index
    %c0_0 = arith.constant 0 : index
    %c0_1 = arith.constant 0 : index
    %1 = vector.load %arg6[%c0, %c0_0, %c0_1] : memref<18x18x32xf32, #tpu.memory_space<vmem>>, vector<1x18x32xf32>
    tpu.vector_store %arg6[%c0, %c0_0, %c0_1], %0 {strides = array<i32>} : memref<18x18x32xf32, #tpu.memory_space<vmem>>, vector<1x18x32xf32>,
    %c17 = arith.constant 17 : index
    %c0_2 = arith.constant 0 : index
    %c0_3 = arith.constant 0 : index
    %2 = vector.load %arg6[%c17, %c0_2, %c0_3] : memref<18x18x32xf32, #tpu.memory_space<vmem>>, vector<1x18x32xf32>
    tpu.vector_store %arg6[%c17, %c0_2, %c0_3], %0 {strides = array<i32>} : memref<18x18x32xf32, #tpu.memory_space<vmem>>, vector<1x18x32xf32>,
    %cst_4 = arith.constant 0.000000e+00 : f32
    %3 = vector.broadcast %cst_4 : f32 to vector<16x1x32xf32>
    %c1 = arith.constant 1 : index
    %c0_5 = arith.constant 0 : index
    %c0_6 = arith.constant 0 : index
    %4 = vector.load %arg6[%c1, %c0_5, %c0_6] : memref<18x18x32xf32, #tpu.memory_space<vmem>>, vector<16x1x32xf32>
    tpu.vector_store %arg6[%c1, %c0_5, %c0_6], %3 {strides = array<i32>} : memref<18x18x32xf32, #tpu.memory_space<vmem>>, vector<16x1x32xf32>,
    %c1_7 = arith.constant 1 : index
    %c17_8 = arith.constant 17 : index
    %c0_9 = arith.constant 0 : index
    %5 = vector.load %arg6[%c1_7, %c17_8, %c0_9] : memref<18x18x32xf32, #tpu.memory_space<vmem>>, vector<16x1x32xf32>
    tpu.vector_store %arg6[%c1_7, %c17_8, %c0_9], %3 {strides = array<i32>} : memref<18x18x32xf32, #tpu.memory_space<vmem>>, vector<16x1x32xf32>,
    %c0_10 = arith.constant 0 : index
    %c0_11 = arith.constant 0 : index
    %c0_12 = arith.constant 0 : index
    %c0_13 = arith.constant 0 : index
    %6 = vector.load %arg2[%c0_10, %c0_11, %c0_12, %c0_13] : memref<1x16x16x32xf32, #tpu.memory_space<vmem>>, vector<1x16x16x32xf32>
    %7 = vector.shape_cast %6 : vector<1x16x16x32xf32> to vector<16x16x32xf32>
    %c1_14 = arith.constant 1 : index
    %c1_15 = arith.constant 1 : index
    %c0_16 = arith.constant 0 : index
    %8 = vector.load %arg6[%c1_14, %c1_15, %c0_16] : memref<18x18x32xf32, #tpu.memory_space<vmem>>, vector<16x16x32xf32>
    tpu.vector_store %arg6[%c1_14, %c1_15, %c0_16], %7 {strides = array<i32>} : memref<18x18x32xf32, #tpu.memory_space<vmem>>, vector<16x16x32xf32>,
    %c0_17 = arith.constant 0 : index
    %c0_18 = arith.constant 0 : index
    %c0_19 = arith.constant 0 : index
    %9 = vector.load %arg3[%c0_17, %c0_18, %c0_19] : memref<3x3x32xf32, #tpu.memory_space<vmem>>, vector<3x3x32xf32>
    %c0_20 = arith.constant 0 : index
    %c0_21 = arith.constant 0 : index
    %10 = vector.load %arg4[%c0_20, %c0_21] : memref<1x32xf32, #tpu.memory_space<vmem>>, vector<1x32xf32>
    %11 = vector.shape_cast %10 : vector<1x32xf32> to vector<32xf32>
    %c0_i32 = arith.constant 0 : i32
    %c8_i32 = arith.constant 8 : i32
    %12 = arith.muli %c0_i32, %c8_i32 : i32
    %13 = tpu.assume_multiple %12, 8 : i32
    %14 = vector.shape_cast %11 : vector<32xf32> to vector<1x1x32xf32>
    %15 = vector.broadcast %14 : vector<1x1x32xf32> to vector<8x16x32xf32>
    %c0_i32_22 = arith.constant 0 : i32
    %16 = arith.addi %13, %c0_i32_22 : i32
    %17 = arith.index_cast %16 : i32 to index
    %c0_23 = arith.constant 0 : index
    %c0_24 = arith.constant 0 : index
    %18 = vector.load %arg6[%17, %c0_23, %c0_24] : memref<18x18x32xf32, #tpu.memory_space<vmem>>, vector<8x16x32xf32>
    %19 = vector.extract_strided_slice %9 {offsets = [0, 0, 0], sizes = [1, 1, 32], strides = [1, 1, 1]} : vector<3x3x32xf32> to vector<1x1x32xf32>
    %20 = vector.shape_cast %19 : vector<1x1x32xf32> to vector<32xf32>
    %21 = vector.shape_cast %20 : vector<32xf32> to vector<1x1x32xf32>
    %22 = vector.broadcast %21 : vector<1x1x32xf32> to vector<8x16x32xf32>
    %23 = arith.mulf %18, %22 : vector<8x16x32xf32>
    %24 = arith.addf %15, %23 : vector<8x16x32xf32>
    %c0_i32_25 = arith.constant 0 : i32
    %25 = arith.addi %13, %c0_i32_25 : i32
    %26 = arith.index_cast %25 : i32 to index
    %c1_26 = arith.constant 1 : index
    %c0_27 = arith.constant 0 : index
    %27 = vector.load %arg6[%26, %c1_26, %c0_27] : memref<18x18x32xf32, #tpu.memory_space<vmem>>, vector<8x16x32xf32>
    %28 = vector.extract_strided_slice %9 {offsets = [0, 1, 0], sizes = [1, 1, 32], strides = [1, 1, 1]} : vector<3x3x32xf32> to vector<1x1x32xf32>
    %29 = vector.shape_cast %28 : vector<1x1x32xf32> to vector<32xf32>
    %30 = vector.shape_cast %29 : vector<32xf32> to vector<1x1x32xf32>
    %31 = vector.broadcast %30 : vector<1x1x32xf32> to vector<8x16x32xf32>
    %32 = arith.mulf %27, %31 : vector<8x16x32xf32>
    %33 = arith.addf %24, %32 : vector<8x16x32xf32>
    %c0_i32_28 = arith.constant 0 : i32
    %34 = arith.addi %13, %c0_i32_28 : i32
    %35 = arith.index_cast %34 : i32 to index
    %c2 = arith.constant 2 : index
    %c0_29 = arith.constant 0 : index
    %36 = vector.load %arg6[%35, %c2, %c0_29] : memref<18x18x32xf32, #tpu.memory_space<vmem>>, vector<8x16x32xf32>
    %37 = vector.extract_strided_slice %9 {offsets = [0, 2, 0], sizes = [1, 1, 32], strides = [1, 1, 1]} : vector<3x3x32xf32> to vector<1x1x32xf32>
    %38 = vector.shape_cast %37 : vector<1x1x32xf32> to vector<32xf32>
    %39 = vector.shape_cast %38 : vector<32xf32> to vector<1x1x32xf32>
    %40 = vector.broadcast %39 : vector<1x1x32xf32> to vector<8x16x32xf32>
    %41 = arith.mulf %36, %40 : vector<8x16x32xf32>
    %42 = arith.addf %33, %41 : vector<8x16x32xf32>
    %c1_i32 = arith.constant 1 : i32
    %43 = arith.addi %13, %c1_i32 : i32
    %44 = arith.index_cast %43 : i32 to index
    %c0_30 = arith.constant 0 : index
    %c0_31 = arith.constant 0 : index
    %45 = vector.load %arg6[%44, %c0_30, %c0_31] : memref<18x18x32xf32, #tpu.memory_space<vmem>>, vector<8x16x32xf32>
    %46 = vector.extract_strided_slice %9 {offsets = [1, 0, 0], sizes = [1, 1, 32], strides = [1, 1, 1]} : vector<3x3x32xf32> to vector<1x1x32xf32>
    %47 = vector.shape_cast %46 : vector<1x1x32xf32> to vector<32xf32>
    %48 = vector.shape_cast %47 : vector<32xf32> to vector<1x1x32xf32>
    %49 = vector.broadcast %48 : vector<1x1x32xf32> to vector<8x16x32xf32>
    %50 = arith.mulf %45, %49 : vector<8x16x32xf32>
    %51 = arith.addf %42, %50 : vector<8x16x32xf32>
    %c1_i32_32 = arith.constant 1 : i32
    %52 = arith.addi %13, %c1_i32_32 : i32
    %53 = arith.index_cast %52 : i32 to index
    %c1_33 = arith.constant 1 : index
    %c0_34 = arith.constant 0 : index
    %54 = vector.load %arg6[%53, %c1_33, %c0_34] : memref<18x18x32xf32, #tpu.memory_space<vmem>>, vector<8x16x32xf32>
    %55 = vector.extract_strided_slice %9 {offsets = [1, 1, 0], sizes = [1, 1, 32], strides = [1, 1, 1]} : vector<3x3x32xf32> to vector<1x1x32xf32>
    %56 = vector.shape_cast %55 : vector<1x1x32xf32> to vector<32xf32>
    %57 = vector.shape_cast %56 : vector<32xf32> to vector<1x1x32xf32>
    %58 = vector.broadcast %57 : vector<1x1x32xf32> to vector<8x16x32xf32>
    %59 = arith.mulf %54, %58 : vector<8x16x32xf32>
    %60 = arith.addf %51, %59 : vector<8x16x32xf32>
    %c1_i32_35 = arith.constant 1 : i32
    %61 = arith.addi %13, %c1_i32_35 : i32
    %62 = arith.index_cast %61 : i32 to index
    %c2_36 = arith.constant 2 : index
    %c0_37 = arith.constant 0 : index
    %63 = vector.load %arg6[%62, %c2_36, %c0_37] : memref<18x18x32xf32, #tpu.memory_space<vmem>>, vector<8x16x32xf32>
    %64 = vector.extract_strided_slice %9 {offsets = [1, 2, 0], sizes = [1, 1, 32], strides = [1, 1, 1]} : vector<3x3x32xf32> to vector<1x1x32xf32>
    %65 = vector.shape_cast %64 : vector<1x1x32xf32> to vector<32xf32>
    %66 = vector.shape_cast %65 : vector<32xf32> to vector<1x1x32xf32>
    %67 = vector.broadcast %66 : vector<1x1x32xf32> to vector<8x16x32xf32>
    %68 = arith.mulf %63, %67 : vector<8x16x32xf32>
    %69 = arith.addf %60, %68 : vector<8x16x32xf32>
    %c2_i32 = arith.constant 2 : i32
    %70 = arith.addi %13, %c2_i32 : i32
    %71 = arith.index_cast %70 : i32 to index
    %c0_38 = arith.constant 0 : index
    %c0_39 = arith.constant 0 : index
    %72 = vector.load %arg6[%71, %c0_38, %c0_39] : memref<18x18x32xf32, #tpu.memory_space<vmem>>, vector<8x16x32xf32>
    %73 = vector.extract_strided_slice %9 {offsets = [2, 0, 0], sizes = [1, 1, 32], strides = [1, 1, 1]} : vector<3x3x32xf32> to vector<1x1x32xf32>
    %74 = vector.shape_cast %73 : vector<1x1x32xf32> to vector<32xf32>
    %75 = vector.shape_cast %74 : vector<32xf32> to vector<1x1x32xf32>
    %76 = vector.broadcast %75 : vector<1x1x32xf32> to vector<8x16x32xf32>
    %77 = arith.mulf %72, %76 : vector<8x16x32xf32>
    %78 = arith.addf %69, %77 : vector<8x16x32xf32>
    %c2_i32_40 = arith.constant 2 : i32
    %79 = arith.addi %13, %c2_i32_40 : i32
    %80 = arith.index_cast %79 : i32 to index
    %c1_41 = arith.constant 1 : index
    %c0_42 = arith.constant 0 : index
    %81 = vector.load %arg6[%80, %c1_41, %c0_42] : memref<18x18x32xf32, #tpu.memory_space<vmem>>, vector<8x16x32xf32>
    %82 = vector.extract_strided_slice %9 {offsets = [2, 1, 0], sizes = [1, 1, 32], strides = [1, 1, 1]} : vector<3x3x32xf32> to vector<1x1x32xf32>
    %83 = vector.shape_cast %82 : vector<1x1x32xf32> to vector<32xf32>
    %84 = vector.shape_cast %83 : vector<32xf32> to vector<1x1x32xf32>
    %85 = vector.broadcast %84 : vector<1x1x32xf32> to vector<8x16x32xf32>
    %86 = arith.mulf %81, %85 : vector<8x16x32xf32>
    %87 = arith.addf %78, %86 : vector<8x16x32xf32>
    %c2_i32_43 = arith.constant 2 : i32
    %88 = arith.addi %13, %c2_i32_43 : i32
    %89 = arith.index_cast %88 : i32 to index
    %c2_44 = arith.constant 2 : index
    %c0_45 = arith.constant 0 : index
    %90 = vector.load %arg6[%89, %c2_44, %c0_45] : memref<18x18x32xf32, #tpu.memory_space<vmem>>, vector<8x16x32xf32>
    %91 = vector.extract_strided_slice %9 {offsets = [2, 2, 0], sizes = [1, 1, 32], strides = [1, 1, 1]} : vector<3x3x32xf32> to vector<1x1x32xf32>
    %92 = vector.shape_cast %91 : vector<1x1x32xf32> to vector<32xf32>
    %93 = vector.shape_cast %92 : vector<32xf32> to vector<1x1x32xf32>
    %94 = vector.broadcast %93 : vector<1x1x32xf32> to vector<8x16x32xf32>
    %95 = arith.mulf %90, %94 : vector<8x16x32xf32>
    %96 = arith.addf %87, %95 : vector<8x16x32xf32>
    %c0_46 = arith.constant 0 : index
    %97 = arith.index_cast %13 : i32 to index
    %c0_47 = arith.constant 0 : index
    %c0_48 = arith.constant 0 : index
    %98 = vector.load %arg5[%c0_46, %97, %c0_47, %c0_48] : memref<1x16x16x32xf32, #tpu.memory_space<vmem>>, vector<1x8x16x32xf32>
    %99 = vector.shape_cast %98 : vector<1x8x16x32xf32> to vector<8x16x32xf32>
    %100 = vector.shape_cast %96 : vector<8x16x32xf32> to vector<1x8x16x32xf32>
    tpu.vector_store %arg5[%c0_46, %97, %c0_47, %c0_48], %100 {strides = array<i32>} : memref<1x16x16x32xf32, #tpu.memory_space<vmem>>, vector<1x8x16x32xf32>,
    %c1_i32_49 = arith.constant 1 : i32
    %c8_i32_50 = arith.constant 8 : i32
    %101 = arith.muli %c1_i32_49, %c8_i32_50 : i32
    %102 = tpu.assume_multiple %101, 8 : i32
    %103 = vector.shape_cast %11 : vector<32xf32> to vector<1x1x32xf32>
    %104 = vector.broadcast %103 : vector<1x1x32xf32> to vector<8x16x32xf32>
    %c0_i32_51 = arith.constant 0 : i32
    %105 = arith.addi %102, %c0_i32_51 : i32
    %106 = arith.index_cast %105 : i32 to index
    %c0_52 = arith.constant 0 : index
    %c0_53 = arith.constant 0 : index
    %107 = vector.load %arg6[%106, %c0_52, %c0_53] : memref<18x18x32xf32, #tpu.memory_space<vmem>>, vector<8x16x32xf32>
    %108 = vector.extract_strided_slice %9 {offsets = [0, 0, 0], sizes = [1, 1, 32], strides = [1, 1, 1]} : vector<3x3x32xf32> to vector<1x1x32xf32>
    %109 = vector.shape_cast %108 : vector<1x1x32xf32> to vector<32xf32>
    %110 = vector.shape_cast %109 : vector<32xf32> to vector<1x1x32xf32>
    %111 = vector.broadcast %110 : vector<1x1x32xf32> to vector<8x16x32xf32>
    %112 = arith.mulf %107, %111 : vector<8x16x32xf32>
    %113 = arith.addf %104, %112 : vector<8x16x32xf32>
    %c0_i32_54 = arith.constant 0 : i32
    %114 = arith.addi %102, %c0_i32_54 : i32
    %115 = arith.index_cast %114 : i32 to index
    %c1_55 = arith.constant 1 : index
    %c0_56 = arith.constant 0 : index
    %116 = vector.load %arg6[%115, %c1_55, %c0_56] : memref<18x18x32xf32, #tpu.memory_space<vmem>>, vector<8x16x32xf32>
    %117 = vector.extract_strided_slice %9 {offsets = [0, 1, 0], sizes = [1, 1, 32], strides = [1, 1, 1]} : vector<3x3x32xf32> to vector<1x1x32xf32>
    %118 = vector.shape_cast %117 : vector<1x1x32xf32> to vector<32xf32>
    %119 = vector.shape_cast %118 : vector<32xf32> to vector<1x1x32xf32>
    %120 = vector.broadcast %119 : vector<1x1x32xf32> to vector<8x16x32xf32>
    %121 = arith.mulf %116, %120 : vector<8x16x32xf32>
    %122 = arith.addf %113, %121 : vector<8x16x32xf32>
    %c0_i32_57 = arith.constant 0 : i32
    %123 = arith.addi %102, %c0_i32_57 : i32
    %124 = arith.index_cast %123 : i32 to index
    %c2_58 = arith.constant 2 : index
    %c0_59 = arith.constant 0 : index
    %125 = vector.load %arg6[%124, %c2_58, %c0_59] : memref<18x18x32xf32, #tpu.memory_space<vmem>>, vector<8x16x32xf32>
    %126 = vector.extract_strided_slice %9 {offsets = [0, 2, 0], sizes = [1, 1, 32], strides = [1, 1, 1]} : vector<3x3x32xf32> to vector<1x1x32xf32>
    %127 = vector.shape_cast %126 : vector<1x1x32xf32> to vector<32xf32>
    %128 = vector.shape_cast %127 : vector<32xf32> to vector<1x1x32xf32>
    %129 = vector.broadcast %128 : vector<1x1x32xf32> to vector<8x16x32xf32>
    %130 = arith.mulf %125, %129 : vector<8x16x32xf32>
    %131 = arith.addf %122, %130 : vector<8x16x32xf32>
    %c1_i32_60 = arith.constant 1 : i32
    %132 = arith.addi %102, %c1_i32_60 : i32
    %133 = arith.index_cast %132 : i32 to index
    %c0_61 = arith.constant 0 : index
    %c0_62 = arith.constant 0 : index
    %134 = vector.load %arg6[%133, %c0_61, %c0_62] : memref<18x18x32xf32, #tpu.memory_space<vmem>>, vector<8x16x32xf32>
    %135 = vector.extract_strided_slice %9 {offsets = [1, 0, 0], sizes = [1, 1, 32], strides = [1, 1, 1]} : vector<3x3x32xf32> to vector<1x1x32xf32>
    %136 = vector.shape_cast %135 : vector<1x1x32xf32> to vector<32xf32>
    %137 = vector.shape_cast %136 : vector<32xf32> to vector<1x1x32xf32>
    %138 = vector.broadcast %137 : vector<1x1x32xf32> to vector<8x16x32xf32>
    %139 = arith.mulf %134, %138 : vector<8x16x32xf32>
    %140 = arith.addf %131, %139 : vector<8x16x32xf32>
    %c1_i32_63 = arith.constant 1 : i32
    %141 = arith.addi %102, %c1_i32_63 : i32
    %142 = arith.index_cast %141 : i32 to index
    %c1_64 = arith.constant 1 : index
    %c0_65 = arith.constant 0 : index
    %143 = vector.load %arg6[%142, %c1_64, %c0_65] : memref<18x18x32xf32, #tpu.memory_space<vmem>>, vector<8x16x32xf32>
    %144 = vector.extract_strided_slice %9 {offsets = [1, 1, 0], sizes = [1, 1, 32], strides = [1, 1, 1]} : vector<3x3x32xf32> to vector<1x1x32xf32>
    %145 = vector.shape_cast %144 : vector<1x1x32xf32> to vector<32xf32>
    %146 = vector.shape_cast %145 : vector<32xf32> to vector<1x1x32xf32>
    %147 = vector.broadcast %146 : vector<1x1x32xf32> to vector<8x16x32xf32>
    %148 = arith.mulf %143, %147 : vector<8x16x32xf32>
    %149 = arith.addf %140, %148 : vector<8x16x32xf32>
    %c1_i32_66 = arith.constant 1 : i32
    %150 = arith.addi %102, %c1_i32_66 : i32
    %151 = arith.index_cast %150 : i32 to index
    %c2_67 = arith.constant 2 : index
    %c0_68 = arith.constant 0 : index
    %152 = vector.load %arg6[%151, %c2_67, %c0_68] : memref<18x18x32xf32, #tpu.memory_space<vmem>>, vector<8x16x32xf32>
    %153 = vector.extract_strided_slice %9 {offsets = [1, 2, 0], sizes = [1, 1, 32], strides = [1, 1, 1]} : vector<3x3x32xf32> to vector<1x1x32xf32>
    %154 = vector.shape_cast %153 : vector<1x1x32xf32> to vector<32xf32>
    %155 = vector.shape_cast %154 : vector<32xf32> to vector<1x1x32xf32>
    %156 = vector.broadcast %155 : vector<1x1x32xf32> to vector<8x16x32xf32>
    %157 = arith.mulf %152, %156 : vector<8x16x32xf32>
    %158 = arith.addf %149, %157 : vector<8x16x32xf32>
    %c2_i32_69 = arith.constant 2 : i32
    %159 = arith.addi %102, %c2_i32_69 : i32
    %160 = arith.index_cast %159 : i32 to index
    %c0_70 = arith.constant 0 : index
    %c0_71 = arith.constant 0 : index
    %161 = vector.load %arg6[%160, %c0_70, %c0_71] : memref<18x18x32xf32, #tpu.memory_space<vmem>>, vector<8x16x32xf32>
    %162 = vector.extract_strided_slice %9 {offsets = [2, 0, 0], sizes = [1, 1, 32], strides = [1, 1, 1]} : vector<3x3x32xf32> to vector<1x1x32xf32>
    %163 = vector.shape_cast %162 : vector<1x1x32xf32> to vector<32xf32>
    %164 = vector.shape_cast %163 : vector<32xf32> to vector<1x1x32xf32>
    %165 = vector.broadcast %164 : vector<1x1x32xf32> to vector<8x16x32xf32>
    %166 = arith.mulf %161, %165 : vector<8x16x32xf32>
    %167 = arith.addf %158, %166 : vector<8x16x32xf32>
    %c2_i32_72 = arith.constant 2 : i32
    %168 = arith.addi %102, %c2_i32_72 : i32
    %169 = arith.index_cast %168 : i32 to index
    %c1_73 = arith.constant 1 : index
    %c0_74 = arith.constant 0 : index
    %170 = vector.load %arg6[%169, %c1_73, %c0_74] : memref<18x18x32xf32, #tpu.memory_space<vmem>>, vector<8x16x32xf32>
    %171 = vector.extract_strided_slice %9 {offsets = [2, 1, 0], sizes = [1, 1, 32], strides = [1, 1, 1]} : vector<3x3x32xf32> to vector<1x1x32xf32>
    %172 = vector.shape_cast %171 : vector<1x1x32xf32> to vector<32xf32>
    %173 = vector.shape_cast %172 : vector<32xf32> to vector<1x1x32xf32>
    %174 = vector.broadcast %173 : vector<1x1x32xf32> to vector<8x16x32xf32>
    %175 = arith.mulf %170, %174 : vector<8x16x32xf32>
    %176 = arith.addf %167, %175 : vector<8x16x32xf32>
    %c2_i32_75 = arith.constant 2 : i32
    %177 = arith.addi %102, %c2_i32_75 : i32
    %178 = arith.index_cast %177 : i32 to index
    %c2_76 = arith.constant 2 : index
    %c0_77 = arith.constant 0 : index
    %179 = vector.load %arg6[%178, %c2_76, %c0_77] : memref<18x18x32xf32, #tpu.memory_space<vmem>>, vector<8x16x32xf32>
    %180 = vector.extract_strided_slice %9 {offsets = [2, 2, 0], sizes = [1, 1, 32], strides = [1, 1, 1]} : vector<3x3x32xf32> to vector<1x1x32xf32>
    %181 = vector.shape_cast %180 : vector<1x1x32xf32> to vector<32xf32>
    %182 = vector.shape_cast %181 : vector<32xf32> to vector<1x1x32xf32>
    %183 = vector.broadcast %182 : vector<1x1x32xf32> to vector<8x16x32xf32>
    %184 = arith.mulf %179, %183 : vector<8x16x32xf32>
    %185 = arith.addf %176, %184 : vector<8x16x32xf32>
    %c0_78 = arith.constant 0 : index
    %186 = arith.index_cast %102 : i32 to index
    %c0_79 = arith.constant 0 : index
    %c0_80 = arith.constant 0 : index
    %187 = vector.load %arg5[%c0_78, %186, %c0_79, %c0_80] : memref<1x16x16x32xf32, #tpu.memory_space<vmem>>, vector<1x8x16x32xf32>
    %188 = vector.shape_cast %187 : vector<1x8x16x32xf32> to vector<8x16x32xf32>
    %189 = vector.shape_cast %185 : vector<8x16x32xf32> to vector<1x8x16x32xf32>
    tpu.vector_store %arg5[%c0_78, %186, %c0_79, %c0_80], %189 {strides = array<i32>} : memref<1x16x16x32xf32, #tpu.memory_space<vmem>>, vector<1x8x16x32xf32>,
    %c2_i32_81 = arith.constant 2 : i32
    return
  }
  func.func @transform_0(%arg0: i32, %arg1: i32) -> (i32, i32, i32, i32) {
    %c0_i32 = arith.constant 0 : i32
    %c0_i32_0 = arith.constant 0 : i32
    %c0_i32_1 = arith.constant 0 : i32
    return %arg0, %c0_i32, %c0_i32_0, %arg1 : i32, i32, i32, i32
  }
  func.func @transform_1(%arg0: i32, %arg1: i32) -> (i32, i32, i32) {
    %c0_i32 = arith.constant 0 : i32
    %c0_i32_0 = arith.constant 0 : i32
    %c0_i32_1 = arith.constant 0 : i32
    return %c0_i32, %c0_i32_0, %arg1 : i32, i32, i32
  }
  func.func @transform_2(%arg0: i32, %arg1: i32) -> (i32, i32) {
    %c0_i32 = arith.constant 0 : i32
    %c0_i32_0 = arith.constant 0 : i32
    return %c0_i32, %arg1 : i32, i32
  }
  func.func @transform_3(%arg0: i32, %arg1: i32) -> (i32, i32, i32, i32) {
    %c0_i32 = arith.constant 0 : i32
    %c0_i32_0 = arith.constant 0 : i32
    %c0_i32_1 = arith.constant 0 : i32
    return %arg0, %c0_i32, %c0_i32_0, %arg1 : i32, i32, i32, i32
  }
}

</mosaic_0001>

<bundles_post_ra>
// kernel: tpu_custom_call.1
= control target key start
LH: loop header
LB: loop body
LE: loop exit
PB: predicated region body
PF: predicated region fallthrough
CT: control target
= control target key end

     0   :  { %8 = vsyncpa [#allocation4], 0  ;;  %s2500_s0 = inlined_call_operand.hbm [shape: f32[2,16,16,32], index: 0, kind: input, shape index: {}]   ;;  %s2501_s1 = inlined_call_operand.hbm [shape: f32[3,3,32], index: 1, kind: input, shape index: {}]   ;;  %s2502_s2 = inlined_call_operand.vmem [shape: f32[1,32], index: 2, kind: input, shape index: {}]   ;;  %s2503_s3 = inlined_call_operand.hbm [shape: f32[2,16,16,32], index: 3, kind: output, shape index: {}]  }
   0x1   :  { %10 = vsyncpa [#allocation4 + $0x1], 0 }
   0x2   :  { %11 = vsyncpa [#allocation7], 0 }
   0x3   :  { %12 = vsyncpa [#allocation5], 0 }
   0x4   :  { %14 = vsyncpa [#allocation5 + $0x1], 0  ;;  %s1735_s12 = smov 0   ;;  %s1737_s13 = smov 0  }
   0x5   :  { %s1739_s14 = smov 0   ;;  %s1741_s15 = smov 0  }
   0x6   :  { %s1743_s16 = smov 0   ;;  %s1745_s17 = smov 0  }
   0x7 LB: > { %s1441_s18 = sadd.s32 4294967295, %s1703_s17   ;;  %s1442_s19 = sadd.s32 4294967294, %s1703_s17   ;;  %s1703_s17 = sphi %s1745_s17, %s20_s17   ;;  %s1699_s16 = sphi %s1743_s16, %s2527_s16   ;;  %s1695_s15 = sphi %s1741_s15, %s2526_s15   ;;  %s1691_s14 = sphi %s1739_s14, %s2525_s14   ;;  %s1687_s13 = sphi %s1737_s13, %s2524_s13   ;;  %s1683_s12 = sphi %s1735_s12, %s2523_s12  }
   0x8   : > { %p54_p0 = scmp.ne.s32.totalorder %s1687_s13, %s1683_s12  ;;  %p1769_p1 = scmp.eq.s32.totalorder %s1441_s18, 0 }
   0x9   : > { %p1773_p2 = scmp.eq.s32.totalorder %s1441_s18, 1  ;;  %p138_p3 = scmp.eq.s32.totalorder %s1442_s19, 1 }
   0xa   : > { %s2508_s20 = scalar_select %p1769_p1, 1, 0 }
   0xb   : > { %s2509_s21 = scalar_select %p1773_p2, 1, 0 }
   0xc   : > { %p1779_p4 = por %p1769_p1, %p54_p0  ;;  %p1443_p5 = scmp.ge.s32.totalorder %s1703_s17, 1 }
   0xd   : > { %p1784_p6 = por %p138_p3, %p54_p0  ;;  %p145_p7 = scmp.lt.s32.totalorder %s1703_s17, 3 }
   0xe   : > { %s2510_s22 = scalar_select %p1779_p4, 1, 0 }
   0xf   : > { %s2511_s23 = scalar_select %p1784_p6, 1, 0 }
  0x10   : > { %p1789_p8 = pnand %p1443_p5, %p145_p7  ;;  %s1705_s25 = smov [#allocation6]  }
  0x11   : > { %s159_s26 = sshll.u32 %s1705_s25, 4  ;;  %s32_s28 = sadd.s32 1, %s1699_s16  ;;  %s160_s26 = int_to_ptr.vmem [resolvable:$true] %s159_s26 }
  0x12   : > { %s2512_s24 = scalar_select %p1789_p8, 1, 0 }
  0x13   : > { %p1486_p9 = pneg %p1789_p8  ;;  %s1559_s4 = scalar_lea.hbm %s2501_s1, 192 }
  0x14   : > { %p1560_p12 = scmp.ne.s32.totalorder %s2501_s1, %s1559_s4  ;;  %p1566_p5 = scmp.lt.u32.totalorder %s1559_s4, %s2501_s1 }
  0x15   : > { %p1798_p11 = pnand %p1486_p9, %p1769_p1 }
  0x17   : > { %p1561_p13 = pneg %p1798_p11 }
  0x19   : > { %p1562_p0 = pnand %p1561_p13, %p1560_p12 }
  0x1b   : > { %p1563_p3 = pneg %p1562_p0 }
  0x1d   : > { %p1568_p7 = pnand %p1566_p5, %p1563_p3 }
  0x1f   : > { %1571 = shalt.err (!%p1568_p7)
}
  0x20   : > { %s1572_s9 = scalar_lea.vmem %s160_s26, 192  ;;  %p1580_p1 = scmp.lt.s32.totalorder %s160_s26, %s160_s26 }
  0x21   : > { %p1573_p9 = scmp.ne.s32.totalorder %s160_s26, %s1572_s9  ;;  %p1581_p4 = scmp.lt.s32.totalorder %s1572_s9, %s1572_s9 }
  0x23   : > { %p1575_p10 = pnand %p1573_p9, %p1561_p13  ;;  %p1582_p8 = por %p1581_p4, %p1580_p1 }
  0x25   : > { %p1576_p6 = pneg %p1575_p10 }
  0x27   : > { %p1583_p2 = pnand %p1582_p8, %p1576_p6 }
  0x29   : > { %1586 = shalt.err (!%p1583_p2)
}
  0x2a   : > { %s1706_s10 = smov 64   ;;  %s1707_s11 = smov 4  }
  0x2b   : > { %1489 = dma.hbm_to_vmem [thread:$0]  (!%p1798_p11), %s2501_s1, 192, %s160_s26, [#allocation7], %s1706_s10, %s1706_s10, %s1707_s11  }
  0x2c   : > { %p34_p1 = scmp.ge.s32.totalorder %s32_s28, 2  ;;  %s41_s25 = sadd.s32 1, %s1691_s14 }
  0x2d   : > { %p48_p2 = scmp.ne.s32.totalorder %s1691_s14, %s1687_s13  ;;  %p49_p4 = scmp.eq.s32.totalorder %s1703_s17, 0 }
  0x2e   : > { %s2529_s28 = smov (%p34_p1, %s32_s28), 0  ;;  %p2515_p8 = scmp.ne.s32.totalorder %s2509_s21, 0 }
  0x2f   : > { %p1825_p6 = por %p49_p4, %p48_p2  ;;  %s36_s27 = ssub.s32 %s1699_s16, %s2529_s28 }
  0x30   : > { %p1831_p10 = por %p2515_p8, %p48_p2  ;;  %p1499_p12 = scmp.lt.s32.totalorder %s1703_s17, 2 }
  0x31   : > { %p39_p11 = scmp.eq.s32.totalorder %s36_s27, 0  ;;  %s179_s26 = sand.u32 1, %s1691_s14  }
  0x32   : > { %s1447_s4 = sshll.u32 %s179_s26, 8  ;;  %s1476_s6 = sshll.u32 %s1699_s16, 12 }
  0x33   : > { %s1840_s5 = scalar_select %p39_p11, %s1691_s14, %s41_s25  }
  0x34   : > { %s1846_s9 = scalar_lea.hbm %s2500_s0, %s1476_s6  ;;  %s183_s21 = scalar_lea.vmem [#allocation3], %s1447_s4 }
  0x35   : > { %s191_s10 = sshll.u32 %s183_s21, 4  ;;  %p1852_p13 = pnand %p1499_p12, %p1825_p6  ;;  %s1848_s10 = int_to_ptr.vmem [resolvable:$true] %s191_s10 }
  0x36   : > { %s1856_s18 = scalar_lea.sflag [#allocation4], %s179_s26  ;;  %s1587_s19 = scalar_lea.hbm %s1846_s9, 4096 }
  0x37   : > { %p1588_p0 = scmp.ne.s32.totalorder %s1846_s9, %s1587_s19  ;;  %p1589_p3 = pneg %p1852_p13 }
  0x38   : > { %s1592_s29 = scalar_lea.hbm %s2500_s0, 8192  ;;  %p1593_p9 = scmp.lt.u32.totalorder %s1846_s9, %s2500_s0 }
  0x39   : > { %p1590_p5 = pnand %p1589_p3, %p1588_p0  ;;  %p1594_p1 = scmp.lt.u32.totalorder %s1592_s29, %s1587_s19 }
  0x3a   : > { %p1596_p4 = scmp.lt.u32.totalorder %s1587_s19, %s1846_s9 }
  0x3b   : > { %p1591_p7 = pneg %p1590_p5  ;;  %p1595_p2 = por %p1594_p1, %p1593_p9 }
  0x3d   : > { %p1597_p6 = por %p1596_p4, %p1595_p2 }
  0x3f   : > { %p1598_p8 = pnand %p1597_p6, %p1591_p7 }
  0x41   : > { %1601 = shalt.err (!%p1598_p8)
}
  0x42   : > { %s1602_s26 = scalar_lea.vmem %s1848_s10, 4096  ;;  %s1708_s7 = smov [#allocation3]  }
  0x43   : > { %p1603_p12 = scmp.ne.s32.totalorder %s1848_s10, %s1602_s26  ;;  %s1607_s8 = sshll.u32 %s1708_s7, 4  ;;  %s1608_s8 = int_to_ptr.vmem [resolvable:$false] %s1607_s8 }
  0x44   : > { %s1609_s21 = scalar_lea.vmem %s1608_s8, 8192  ;;  %p1610_p5 = scmp.lt.s32.totalorder %s1848_s10, %s1608_s8 }
  0x45   : > { %p1605_p11 = pnand %p1603_p12, %p1589_p3  ;;  %p1611_p9 = scmp.lt.s32.totalorder %s1609_s21, %s1602_s26 }
  0x47   : > { %p1606_p0 = pneg %p1605_p11  ;;  %p1612_p1 = por %p1611_p9, %p1610_p5 }
  0x49   : > { %p1613_p2 = pnand %p1612_p1, %p1606_p0 }
  0x4b   : > { %1616 = shalt.err (!%p1613_p2)
}
  0x4c   : > { %s1709_s19 = smov 128   ;;  %s1710_s25 = smov 8  }
  0x4d   : > { %1493 = dma.hbm_to_vmem [thread:$0]  (!%p1852_p13), %s1846_s9, 4096, %s1848_s10, %s1856_s18, %s1709_s19, %s1709_s19, %s1710_s25  }
  0x4e   : > { %p2518_p3 = scmp.ne.s32.totalorder %s2512_s24, 0 }
  0x4f   : > { %s1887_s27 = sand.u32 (!%p2518_p3), 1, %s1687_s13   ;;  %p2519_p7 = scmp.ne.s32.totalorder (!%p2518_p3), %s2510_s22, 0 }
  0x50   : > { %203 = sbr.rel (%p2518_p3) target bundleno = 287 (0x11f), region = 32  ;;  %s1451_s29 = sshll.u32 (!%p2518_p3), %s1887_s27, 8 }
  0x51   : > { %s206_s4 = scalar_lea.sflag (!%p2518_p3), [#allocation4], %s1887_s27  ;;  %s1893_s6 = scalar_lea.vmem (!%p2518_p3), [#allocation3], %s1451_s29 }
  0x57   : > { %1670 = dma.done.wait (%p2519_p7), %s206_s4, 4096  }
  0x58   : > { %1672 = vsyncadd (%p2519_p7), %s206_s4, 4294963200  ;;  %p2520_p13 = scmp.ne.s32.totalorder %s2508_s20, 0 }
  0x5a   : > { %1674 = dma.done.wait (%p2520_p13), [#allocation7], 192  }
  0x5b   : > { %1676 = vsyncadd (%p2520_p13), [#allocation7], 4294967104  ;;  %vm242_vm0 = vcmask 261120   ;;  %vm245_vm1 = vcmask 254976   ;;  %vm252_vm2 = vcmask 253952   ;;  %v1711_v0 = vmov 0.0  }
  0x5c   : > { %243 = vst.msk [vmem:[#allocation2] sm:$0xff] %vm242_vm0, %v1711_v0  ;;  %244 = vst.msk [vmem:[#allocation2 + $0x8] sm:$0xff] %vm242_vm0, %v1711_v0  ;;  %v377_v1 = vlaneseq  ;;  %v285_v2 = vld [vmem:[%s1893_s6] sm:$0xff]  ;;  %v286_v3 = vld [vmem:[%s1893_s6 + $0x8] sm:$0xff]  ;;  %s2089_s24 = scalar_lea.vmem [#allocation8], %s1451_s29  ;;  %s1477_s11 = sshll.u32 %s1695_s15, 12 }
  0x5d   : > { %248 = vst.msk [vmem:[#allocation2 + $0x198] sm:$0xff] %vm242_vm0, %v1711_v0  ;;  %249 = vst.msk [vmem:[#allocation2 + $0x1a0] sm:$0xff] %vm242_vm0, %v1711_v0  ;;  %v287_v4 = vld [vmem:[%s1893_s6 + $0x10] sm:$0xff]  ;;  %v288_v5 = vld [vmem:[%s1893_s6 + $0x18] sm:$0xff]  ;;  %s1326_s18 = sshll.u32 %s2089_s24, 4  ;;  %s2447_s8 = scalar_lea.hbm %s2503_s3, %s1477_s11  ;;  %s2449_s18 = int_to_ptr.vmem [resolvable:$true] %s1326_s18 }
  0x5e   : > { %246 = vst.msk [vmem:[#allocation2 + $0x10] sm:$0x3] %vm245_vm1, %v1711_v0  ;;  %250 = vst.msk [vmem:[#allocation2 + $0x1a8] sm:$0x3] %vm245_vm1, %v1711_v0  ;;  %v289_v6 = vld [vmem:[%s1893_s6 + $0x20] sm:$0xff]  ;;  %v290_v7 = vld [vmem:[%s1893_s6 + $0x28] sm:$0xff] }
  0x5f   : > { %253 = vst.msk [vmem:[#allocation2 + $0x18] sm:$0x1] %vm252_vm2, %v1711_v0  ;;  %254 = vst.msk [vmem:[#allocation2 + $0x30] sm:$0x1] %vm252_vm2, %v1711_v0  ;;  %v291_v8 = vld [vmem:[%s1893_s6 + $0x30] sm:$0xff]  ;;  %v292_v9 = vld [vmem:[%s1893_s6 + $0x38] sm:$0xff] }
  0x60   : > { %255 = vst.msk [vmem:[#allocation2 + $0x48] sm:$0x1] %vm252_vm2, %v1711_v0  ;;  %256 = vst.msk [vmem:[#allocation2 + $0x60] sm:$0x1] %vm252_vm2, %v1711_v0  ;;  %v293_v10 = vld [vmem:[%s1893_s6 + $0x40] sm:$0xff]  ;;  %v294_v11 = vld [vmem:[%s1893_s6 + $0x48] sm:$0xff] }
  0x61   : > { %257 = vst.msk [vmem:[#allocation2 + $0x78] sm:$0x1] %vm252_vm2, %v1711_v0  ;;  %258 = vst.msk [vmem:[#allocation2 + $0x90] sm:$0x1] %vm252_vm2, %v1711_v0  ;;  %v295_v12 = vld [vmem:[%s1893_s6 + $0x50] sm:$0xff]  ;;  %v296_v13 = vld [vmem:[%s1893_s6 + $0x58] sm:$0xff] }
  0x62   : > { %259 = vst.msk [vmem:[#allocation2 + $0xa8] sm:$0x1] %vm252_vm2, %v1711_v0  ;;  %260 = vst.msk [vmem:[#allocation2 + $0xc0] sm:$0x1] %vm252_vm2, %v1711_v0  ;;  %v378_v14 = vshrl.u32 %v377_v1, 7  ;;  %v297_v15 = vld [vmem:[%s1893_s6 + $0x60] sm:$0xff] }
  0x63   : > { %261 = vst.msk [vmem:[#allocation2 + $0xd8] sm:$0x1] %vm252_vm2, %v1711_v0  ;;  %262 = vst.msk [vmem:[#allocation2 + $0xf0] sm:$0x1] %vm252_vm2, %v1711_v0  ;;  %v298_v16 = vld [vmem:[%s1893_s6 + $0x68] sm:$0xff]  ;;  %v299_v17 = vld [vmem:[%s1893_s6 + $0x70] sm:$0xff] }
  0x64   : > { %263 = vst.msk [vmem:[#allocation2 + $0x108] sm:$0x1] %vm252_vm2, %v1711_v0  ;;  %264 = vst.msk [vmem:[#allocation2 + $0x120] sm:$0x1] %vm252_vm2, %v1711_v0  ;;  %v300_v18 = vld [vmem:[%s1893_s6 + $0x78] sm:$0xff]  ;;  %v301_v19 = vld [vmem:[%s1893_s6 + $0x80] sm:$0xff] }
  0x65   : > { %265 = vst.msk [vmem:[#allocation2 + $0x138] sm:$0x1] %vm252_vm2, %v1711_v0  ;;  %266 = vst.msk [vmem:[#allocation2 + $0x150] sm:$0x1] %vm252_vm2, %v1711_v0  ;;  %v302_v20 = vld [vmem:[%s1893_s6 + $0x88] sm:$0xff]  ;;  %v303_v21 = vld [vmem:[%s1893_s6 + $0x90] sm:$0xff] }
  0x66   : > { %267 = vst.msk [vmem:[#allocation2 + $0x168] sm:$0x1] %vm252_vm2, %v1711_v0  ;;  %268 = vst.msk [vmem:[#allocation2 + $0x180] sm:$0x1] %vm252_vm2, %v1711_v0  ;;  %v304_v22 = vld [vmem:[%s1893_s6 + $0x98] sm:$0xff]  ;;  %v305_v23 = vld [vmem:[%s1893_s6 + $0xa0] sm:$0xff] }
  0x67   : > { %269 = vst.msk [vmem:[#allocation2 + $0x29] sm:$0x1] %vm252_vm2, %v1711_v0  ;;  %270 = vst.msk [vmem:[#allocation2 + $0x41] sm:$0x1] %vm252_vm2, %v1711_v0  ;;  %v306_v24 = vld [vmem:[%s1893_s6 + $0xa8] sm:$0xff]  ;;  %v307_v25 = vld [vmem:[%s1893_s6 + $0xb0] sm:$0xff] }
  0x68   : > { %271 = vst.msk [vmem:[#allocation2 + $0x59] sm:$0x1] %vm252_vm2, %v1711_v0  ;;  %272 = vst.msk [vmem:[#allocation2 + $0x71] sm:$0x1] %vm252_vm2, %v1711_v0  ;;  %v308_v26 = vld [vmem:[%s1893_s6 + $0xb8] sm:$0xff]  ;;  %v379_v27 = vsub.s32 0, %v378_v14 }
  0x69   : > { %273 = vst.msk [vmem:[#allocation2 + $0x89] sm:$0x1] %vm252_vm2, %v1711_v0  ;;  %274 = vst.msk [vmem:[#allocation2 + $0xa1] sm:$0x1] %vm252_vm2, %v1711_v0  ;;  %v431_v28 = vsub.s32 1, %v378_v14  ;;  %v483_v29 = vsub.s32 2, %v378_v14 }
  0x6a   : > { %275 = vst.msk [vmem:[#allocation2 + $0xb9] sm:$0x1] %vm252_vm2, %v1711_v0  ;;  %276 = vst.msk [vmem:[#allocation2 + $0xd1] sm:$0x1] %vm252_vm2, %v1711_v0  ;;  %v309_v30 = vld [vmem:[%s1893_s6 + $0xc0] sm:$0xff]  ;;  %v310_v31 = vld [vmem:[%s1893_s6 + $0xc8] sm:$0xff] }
  0x6b   : > { %277 = vst.msk [vmem:[#allocation2 + $0xe9] sm:$0x1] %vm252_vm2, %v1711_v0  ;;  %278 = vst.msk [vmem:[#allocation2 + $0x101] sm:$0x1] %vm252_vm2, %v1711_v0  ;;  %v311_v32 = vld [vmem:[%s1893_s6 + $0xd0] sm:$0xff]  ;;  %v312_v33 = vld [vmem:[%s1893_s6 + $0xd8] sm:$0xff] }
  0x6c   : > { %279 = vst.msk [vmem:[#allocation2 + $0x119] sm:$0x1] %vm252_vm2, %v1711_v0  ;;  %280 = vst.msk [vmem:[#allocation2 + $0x131] sm:$0x1] %vm252_vm2, %v1711_v0  ;;  %v313_v34 = vld [vmem:[%s1893_s6 + $0xe0] sm:$0xff]  ;;  %v314_v35 = vld [vmem:[%s1893_s6 + $0xe8] sm:$0xff] }
  0x6d   : > { %281 = vst.msk [vmem:[#allocation2 + $0x149] sm:$0x1] %vm252_vm2, %v1711_v0  ;;  %282 = vst.msk [vmem:[#allocation2 + $0x161] sm:$0x1] %vm252_vm2, %v1711_v0  ;;  %v315_v36 = vld [vmem:[%s1893_s6 + $0xf0] sm:$0xff]  ;;  %v316_v37 = vld [vmem:[%s1893_s6 + $0xf8] sm:$0xff] }
  0x6e   : > { %283 = vst.msk [vmem:[#allocation2 + $0x179] sm:$0x1] %vm252_vm2, %v1711_v0  ;;  %284 = vst.msk [vmem:[#allocation2 + $0x191] sm:$0x1] %vm252_vm2, %v1711_v0  ;;  %v349_v38 = vld [vmem:[#allocation6] sm:$0x7] }
  0x6f   : > { %317 = vst.msk [vmem:[#allocation2 + $0x19] sm:$0xff] %vm242_vm0, %v285_v2  ;;  %318 = vst.msk [vmem:[#allocation2 + $0x21] sm:$0xff] %vm242_vm0, %v286_v3  ;;  %v350_v39 = vld [vmem:[#allocation6 + $0x4] sm:$0x7]  ;;  %v351_v40 = vld [vmem:[#allocation6 + $0x8] sm:$0x7]  ;;  %v2008_v42 = vrot.slane %v349_v38, %v379_v27  ;;  %v2010_v43 = vrot.slane %v349_v38, %v431_v28  ;;  %v2012_v44 = vrot.slane %v349_v38, %v483_v29 }
  0x70   : > { %319 = vst.msk [vmem:[#allocation2 + $0x31] sm:$0xff] %vm242_vm0, %v287_v4  ;;  %320 = vst.msk [vmem:[#allocation2 + $0x39] sm:$0xff] %vm242_vm0, %v288_v5  ;;  %v2006_v41 = vld [vmem:[%s2502_s2] ss:$0 sm:$0xff]  ;;  %v413_v46 = vld [vmem:[#allocation2 + $0x1] sm:$0xff]  ;;  %v2016_v51 = vrot.slane %v350_v39, %v379_v27  ;;  %v2018_v52 = vrot.slane %v350_v39, %v431_v28  ;;  %v2020_v55 = vrot.slane %v350_v39, %v483_v29  ;;  %s1312_s15 = scalar_lea.sflag [#allocation5], %s1887_s27 }
  0x71   : > { %321 = vst.msk [vmem:[#allocation2 + $0x49] sm:$0xff] %vm242_vm0, %v289_v6  ;;  %322 = vst.msk [vmem:[#allocation2 + $0x51] sm:$0xff] %vm242_vm0, %v290_v7  ;;  %v361_v45 = vld [vmem:[#allocation2] sm:$0xff]  ;;  %v433_v49 = vmul.f32 %v2010_v43, %v413_v46  ;;  %v2022_v57 = vrot.slane %v351_v40, %v379_v27  ;;  %v2026_v60 = vrot.slane %v351_v40, %v431_v28  ;;  %v362_v61 = vld [vmem:[#allocation2 + $0x8] sm:$0xff]  ;;  %s1617_s21 = scalar_lea.vmem %s2449_s18, 4096  ;;  %s1712_s19 = smov [#allocation8]  }
  0x72   : > { %323 = vst.msk [vmem:[#allocation2 + $0x61] sm:$0xff] %vm242_vm0, %v291_v8  ;;  %324 = vst.msk [vmem:[#allocation2 + $0x69] sm:$0xff] %vm242_vm0, %v292_v9  ;;  %v465_v47 = vld [vmem:[#allocation2 + $0x2] sm:$0xff]  ;;  %v381_v48 = vmul.f32 %v2008_v42, %v361_v45  ;;  %v466_v63 = vld [vmem:[#allocation2 + $0xa] sm:$0xff]  ;;  %v2029_v2 = vrot.slane %v351_v40, %v483_v29  ;;  %v382_v3 = vmul.f32 %v2008_v42, %v362_v61  ;;  %p1618_p4 = scmp.ne.s32.totalorder %s2449_s18, %s1617_s21  ;;  %s1621_s25 = sshll.u32 %s1712_s19, 4  ;;  %s1622_s25 = int_to_ptr.vmem [resolvable:$false] %s1621_s25 }
  0x73   : > { %325 = vst.msk [vmem:[#allocation2 + $0x79] sm:$0xff] %vm242_vm0, %v293_v10  ;;  %326 = vst.msk [vmem:[#allocation2 + $0x81] sm:$0xff] %vm242_vm0, %v294_v11  ;;  %v485_v59 = vmul.f32 %v2012_v44, %v465_v47  ;;  %v414_v62 = vld [vmem:[#allocation2 + $0x9] sm:$0xff]  ;;  %v486_v14 = vmul.f32 %v2012_v44, %v466_v63  ;;  %s1623_s29 = scalar_lea.vmem %s1622_s25, 8192  ;;  %p1624_p12 = scmp.lt.s32.totalorder %s2449_s18, %s1622_s25 }
  0x74   : > { %327 = vst.msk [vmem:[#allocation2 + $0x91] sm:$0xff] %vm242_vm0, %v295_v12  ;;  %328 = vst.msk [vmem:[#allocation2 + $0x99] sm:$0xff] %vm242_vm0, %v296_v13  ;;  %v397_v58 = vadd.f32 %v2006_v41, %v381_v48  ;;  %v434_v4 = vmul.f32 %v2010_v43, %v414_v62  ;;  %v398_v13 = vadd.f32 %v2006_v41, %v382_v3  ;;  %p1619_p6 = pnand %p1618_p4, %p1831_p10  ;;  %p1625_p11 = scmp.lt.s32.totalorder %s1623_s29, %s1617_s21 }
  0x75   : > { %329 = vst.msk [vmem:[#allocation2 + $0xa9] sm:$0xff] %vm242_vm0, %v297_v15  ;;  %330 = vst.msk [vmem:[#allocation2 + $0xb1] sm:$0xff] %vm242_vm0, %v298_v16 }
  0x76   : > { %331 = vst.msk [vmem:[#allocation2 + $0xc1] sm:$0xff] %vm242_vm0, %v299_v17  ;;  %332 = vst.msk [vmem:[#allocation2 + $0xc9] sm:$0xff] %vm242_vm0, %v300_v18  ;;  %v520_v50 = vld [vmem:[#allocation2 + $0x18] sm:$0xff]  ;;  %v449_v5 = vadd.f32 %v433_v49, %v397_v58  ;;  %v521_v9 = vld [vmem:[#allocation2 + $0x20] sm:$0xff]  ;;  %p1620_p8 = pneg %p1619_p6  ;;  %p1626_p0 = por %p1625_p11, %p1624_p12 }
  0x77   : > { %333 = vst.msk [vmem:[#allocation2 + $0xd9] sm:$0xff] %vm242_vm0, %v301_v19  ;;  %334 = vst.msk [vmem:[#allocation2 + $0xe1] sm:$0xff] %vm242_vm0, %v302_v20  ;;  %v572_v53 = vld [vmem:[#allocation2 + $0x19] sm:$0xff]  ;;  %v679_v56 = vld [vmem:[#allocation2 + $0x30] sm:$0xff]  ;;  %v383_v0 = vmul.f32 %v520_v50, %v2008_v42  ;;  %v540_v6 = vmul.f32 %v2016_v51, %v520_v50 }
  0x78   : > { %335 = vst.msk [vmem:[#allocation2 + $0xf1] sm:$0xff] %vm242_vm0, %v303_v21  ;;  %336 = vst.msk [vmem:[#allocation2 + $0xf9] sm:$0xff] %vm242_vm0, %v304_v22  ;;  %v624_v54 = vld [vmem:[#allocation2 + $0x1a] sm:$0xff]  ;;  %v731_v1 = vld [vmem:[#allocation2 + $0x31] sm:$0xff]  ;;  %v592_v7 = vmul.f32 %v2018_v52, %v572_v53  ;;  %v699_v12 = vmul.f32 %v2022_v57, %v679_v56  ;;  %v501_v16 = vadd.f32 %v485_v59, %v449_v5  ;;  %p1627_p5 = pnand %p1626_p0, %p1620_p8 }
  0x79   : > { %337 = vst.msk [vmem:[#allocation2 + $0x109] sm:$0xff] %vm242_vm0, %v305_v23  ;;  %338 = vst.msk [vmem:[#allocation2 + $0x111] sm:$0xff] %vm242_vm0, %v306_v24  ;;  %v783_v8 = vld [vmem:[#allocation2 + $0x32] sm:$0xff]  ;;  %v573_v10 = vld [vmem:[#allocation2 + $0x21] sm:$0xff]  ;;  %v644_v11 = vmul.f32 %v2020_v55, %v624_v54  ;;  %v751_v17 = vmul.f32 %v2026_v60, %v731_v1  ;;  %v399_v20 = vadd.f32 %v2006_v41, %v383_v0 }
  0x7a   : > { %339 = vst.msk [vmem:[#allocation2 + $0x121] sm:$0xff] %vm242_vm0, %v307_v25  ;;  %340 = vst.msk [vmem:[#allocation2 + $0x129] sm:$0xff] %vm242_vm0, %v308_v26  ;;  %v625_v15 = vld [vmem:[#allocation2 + $0x22] sm:$0xff]  ;;  %v680_v18 = vld [vmem:[#allocation2 + $0x38] sm:$0xff]  ;;  %v435_v21 = vmul.f32 %v572_v53, %v2010_v43  ;;  %v803_v22 = vmul.f32 %v2029_v2, %v783_v8  ;;  %v450_v23 = vadd.f32 %v434_v4, %v398_v13 }
  0x7b   : > { %341 = vst.msk [vmem:[#allocation2 + $0x139] sm:$0xff] %vm242_vm0, %v309_v30  ;;  %342 = vst.msk [vmem:[#allocation2 + $0x141] sm:$0xff] %vm242_vm0, %v310_v31  ;;  %v2040_v19 = vld [vmem:[#allocation2 + $0x39] sm:$0xff]  ;;  %v541_v24 = vmul.f32 %v2016_v51, %v521_v9  ;;  %v593_v25 = vmul.f32 %v2018_v52, %v573_v10  ;;  %v556_v27 = vadd.f32 %v540_v6, %v501_v16  ;;  %v2061_v46 = vld [vmem:[#allocation2 + $0x49] sm:$0xff] }
  0x7c   : > { %343 = vst.msk [vmem:[#allocation2 + $0x151] sm:$0xff] %vm242_vm0, %v311_v32  ;;  %344 = vst.msk [vmem:[#allocation2 + $0x159] sm:$0xff] %vm242_vm0, %v312_v33  ;;  %v2047_v26 = vld [vmem:[#allocation2 + $0x3a] sm:$0xff]  ;;  %v645_v28 = vmul.f32 %v2020_v55, %v625_v15  ;;  %v451_v29 = vadd.f32 %v435_v21, %v399_v20  ;;  %v487_v30 = vmul.f32 %v624_v54, %v2012_v44  ;;  %v2068_v59 = vld [vmem:[#allocation2 + $0x4a] sm:$0xff] }
  0x7d   : > { %345 = vst.msk [vmem:[#allocation2 + $0x169] sm:$0xff] %vm242_vm0, %v313_v34  ;;  %346 = vst.msk [vmem:[#allocation2 + $0x171] sm:$0xff] %vm242_vm0, %v314_v35  ;;  %v502_v31 = vadd.f32 %v486_v14, %v450_v23  ;;  %v700_v32 = vmul.f32 %v2022_v57, %v680_v18  ;;  %v752_v33 = vmul.f32 %v2026_v60, %v2040_v19  ;;  %v2054_v34 = vld [vmem:[#allocation2 + $0x48] sm:$0xff]  ;;  %v682_v16 = vld [vmem:[#allocation2 + $0x50] sm:$0xff] }
  0x7e   : > { %347 = vst.msk [vmem:[#allocation2 + $0x181] sm:$0xff] %vm242_vm0, %v315_v36  ;;  %348 = vst.msk [vmem:[#allocation2 + $0x189] sm:$0xff] %vm242_vm0, %v316_v37  ;;  %v384_v35 = vmul.f32 %v521_v9, %v2008_v42  ;;  %v608_v36 = vadd.f32 %v592_v7, %v556_v27  ;;  %v804_v37 = vmul.f32 %v2029_v2, %v2047_v26 }
  0x7f   : > { %v503_v38 = vadd.f32 %v487_v30, %v451_v29  ;;  %v542_v39 = vmul.f32 %v679_v56, %v2016_v51  ;;  %v557_v40 = vadd.f32 %v541_v24, %v502_v31  ;;  %v594_v45 = vmul.f32 %v731_v1, %v2018_v52 }
  0x80   : > { %v400_v47 = vadd.f32 %v2006_v41, %v384_v35  ;;  %v436_v48 = vmul.f32 %v573_v10, %v2010_v43  ;;  %v660_v49 = vadd.f32 %v644_v11, %v608_v36  ;;  %v646_v53 = vmul.f32 %v783_v8, %v2020_v55 }
  0x81   : > { %v558_v50 = vadd.f32 %v542_v39, %v503_v38  ;;  %v701_v54 = vmul.f32 %v2022_v57, %v2054_v34  ;;  %v609_v58 = vadd.f32 %v593_v25, %v557_v40  ;;  %v488_v62 = vmul.f32 %v625_v15, %v2012_v44  ;;  %v683_v38 = vld [vmem:[#allocation2 + $0x60] sm:$0xff] }
  0x82   : > { %v452_v61 = vadd.f32 %v436_v48, %v400_v47  ;;  %v385_v63 = vmul.f32 %v679_v56, %v2008_v42  ;;  %v715_v0 = vadd.f32 %v699_v12, %v660_v49  ;;  %v753_v4 = vmul.f32 %v2026_v60, %v2061_v46 }
  0x83   : > { %v610_v3 = vadd.f32 %v594_v45, %v558_v50  ;;  %v543_v5 = vmul.f32 %v680_v18, %v2016_v51  ;;  %v661_v6 = vadd.f32 %v645_v28, %v609_v58  ;;  %v437_v10 = vmul.f32 %v731_v1, %v2010_v43  ;;  %v734_v28 = vld [vmem:[#allocation2 + $0x51] sm:$0xff]  ;;  %v735_v50 = vld [vmem:[#allocation2 + $0x61] sm:$0xff] }
  0x84   : > { %v504_v7 = vadd.f32 %v488_v62, %v452_v61  ;;  %v401_v9 = vadd.f32 %v2006_v41, %v385_v63  ;;  %v767_v11 = vadd.f32 %v751_v17, %v715_v0  ;;  %v805_v14 = vmul.f32 %v2029_v2, %v2068_v59  ;;  %v787_v63 = vld [vmem:[#allocation2 + $0x62] sm:$0xff] }
  0x85   : > { %v662_v13 = vadd.f32 %v646_v53, %v610_v3  ;;  %v595_v56 = vmul.f32 %v2040_v19, %v2018_v52  ;;  %v716_v12 = vadd.f32 %v700_v32, %v661_v6  ;;  %v489_v21 = vmul.f32 %v783_v8, %v2012_v44 }
  0x86   : > { %v559_v15 = vadd.f32 %v543_v5, %v504_v7  ;;  %v453_v20 = vadd.f32 %v437_v10, %v401_v9  ;;  %v819_v23 = vadd.f32 %v803_v22, %v767_v11  ;;  %v647_v1 = vmul.f32 %v2047_v26, %v2020_v55  ;;  %v684_v5 = vld [vmem:[#allocation2 + $0x68] sm:$0xff] }
  0x87   : > { %v717_v24 = vadd.f32 %v701_v54, %v662_v13  ;;  %v544_v17 = vmul.f32 %v2054_v34, %v2016_v51  ;;  %v768_v25 = vadd.f32 %v752_v33, %v716_v12  ;;  %v386_v30 = vmul.f32 %v680_v18, %v2008_v42  ;;  %v786_v18 = vld [vmem:[#allocation2 + $0x52] sm:$0xff]  ;;  %v736_v13 = vld [vmem:[#allocation2 + $0x69] sm:$0xff] }
  0x88   : > { %v611_v27 = vadd.f32 %v595_v56, %v559_v15  ;;  %v505_v29 = vadd.f32 %v489_v21, %v453_v20  ;;  %837 = vst.msk [vmem:[%s2089_s24] sm:$0xff] %vm242_vm0, %v819_v23  ;;  %v702_v22 = vmul.f32 %v2022_v57, %v682_v16  ;;  %v596_v31 = vmul.f32 %v2061_v46, %v2018_v52  ;;  %v788_v23 = vld [vmem:[#allocation2 + $0x6a] sm:$0xff] }
  0x89   : > { %v769_v8 = vadd.f32 %v753_v4, %v717_v24  ;;  %v438_v32 = vmul.f32 %v2040_v19, %v2010_v43  ;;  %v820_v33 = vadd.f32 %v804_v37, %v768_v25  ;;  %v402_v39 = vadd.f32 %v2006_v41, %v386_v30 }
  0x8a   : > { %v663_v35 = vadd.f32 %v647_v1, %v611_v27  ;;  %v560_v36 = vadd.f32 %v544_v17, %v505_v29  ;;  %v754_v45 = vmul.f32 %v2026_v60, %v734_v28  ;;  %v648_v47 = vmul.f32 %v2068_v59, %v2020_v55 }
  0x8b   : > { %v821_v40 = vadd.f32 %v805_v14, %v769_v8  ;;  %838 = vst.msk [vmem:[%s2089_s24 + $0x8] sm:$0xff] %vm242_vm0, %v820_v33  ;;  %v454_v19 = vadd.f32 %v438_v32, %v402_v39  ;;  %v490_v37 = vmul.f32 %v2047_v26, %v2012_v44  ;;  %v806_v53 = vmul.f32 %v2029_v2, %v786_v18  ;;  %v685_v8 = vld [vmem:[#allocation2 + $0x78] sm:$0xff] }
  0x8c   : > { %v718_v48 = vadd.f32 %v702_v22, %v663_v35  ;;  %v612_v49 = vadd.f32 %v596_v31, %v560_v36  ;;  %v703_v54 = vmul.f32 %v2022_v57, %v683_v38  ;;  %v387_v58 = vmul.f32 %v2054_v34, %v2008_v42  ;;  %v737_v22 = vld [vmem:[#allocation2 + $0x79] sm:$0xff] }
  0x8d   : > { %839 = vst.msk [vmem:[%s2089_s24 + $0x10] sm:$0xff] %vm242_vm0, %v821_v40  ;;  %v506_v0 = vadd.f32 %v490_v37, %v454_v19  ;;  %v545_v3 = vmul.f32 %v682_v16, %v2016_v51  ;;  %v755_v4 = vmul.f32 %v2026_v60, %v735_v50  ;;  %v439_v6 = vmul.f32 %v2061_v46, %v2010_v43 }
  0x8e   : > { %v770_v61 = vadd.f32 %v754_v45, %v718_v48  ;;  %v664_v62 = vadd.f32 %v648_v47, %v612_v49  ;;  %v403_v26 = vadd.f32 %v2006_v41, %v387_v58  ;;  %v597_v34 = vmul.f32 %v734_v28, %v2018_v52  ;;  %v789_v45 = vld [vmem:[#allocation2 + $0x7a] sm:$0xff] }
  0x8f   : > { %v561_v10 = vadd.f32 %v545_v3, %v506_v0  ;;  %v807_v11 = vmul.f32 %v2029_v2, %v787_v63  ;;  %v491_v56 = vmul.f32 %v2068_v59, %v2012_v44  ;;  %v388_v12 = vmul.f32 %v682_v16, %v2008_v42  ;;  %v686_v58 = vld [vmem:[#allocation2 + $0x80] sm:$0xff] }
  0x90   : > { %v822_v7 = vadd.f32 %v806_v53, %v770_v61  ;;  %v719_v9 = vadd.f32 %v703_v54, %v664_v62  ;;  %v455_v14 = vadd.f32 %v439_v6, %v403_v26  ;;  %v649_v46 = vmul.f32 %v786_v18, %v2020_v55  ;;  %v738_v61 = vld [vmem:[#allocation2 + $0x81] sm:$0xff] }
  0x91   : > { %v613_v20 = vadd.f32 %v597_v34, %v561_v10  ;;  %v704_v21 = vmul.f32 %v2022_v57, %v684_v5  ;;  %v546_v1 = vmul.f32 %v683_v38, %v2016_v51  ;;  %v404_v17 = vadd.f32 %v2006_v41, %v388_v12 }
  0x92   : > { %840 = vst.msk [vmem:[%s2089_s24 + $0x18] sm:$0xff] %vm242_vm0, %v822_v7  ;;  %v771_v15 = vadd.f32 %v755_v4, %v719_v9  ;;  %v507_v24 = vadd.f32 %v491_v56, %v455_v14  ;;  %v440_v25 = vmul.f32 %v734_v28, %v2010_v43  ;;  %v756_v16 = vmul.f32 %v2026_v60, %v736_v13  ;;  %v790_v9 = vld [vmem:[#allocation2 + $0x82] sm:$0xff] }
  0x93   : > { %v665_v27 = vadd.f32 %v649_v46, %v613_v20  ;;  %v598_v29 = vmul.f32 %v735_v50, %v2018_v52  ;;  %v492_v32 = vmul.f32 %v786_v18, %v2012_v44  ;;  %v389_v33 = vmul.f32 %v683_v38, %v2008_v42 }
  0x94   : > { %v823_v59 = vadd.f32 %v807_v11, %v771_v15  ;;  %v562_v30 = vadd.f32 %v546_v1, %v507_v24  ;;  %v456_v31 = vadd.f32 %v440_v25, %v404_v17  ;;  %v808_v36 = vmul.f32 %v2029_v2, %v788_v23  ;;  %v739_v24 = vld [vmem:[#allocation2 + $0x91] sm:$0xff] }
  0x95   : > { %v720_v35 = vadd.f32 %v704_v21, %v665_v27  ;;  %v650_v28 = vmul.f32 %v787_v63, %v2020_v55  ;;  %v547_v39 = vmul.f32 %v684_v5, %v2016_v51  ;;  %v405_v48 = vadd.f32 %v2006_v41, %v389_v33  ;;  %v687_v21 = vld [vmem:[#allocation2 + $0x90] sm:$0xff] }
  0x96   : > { %841 = vst.msk [vmem:[%s2089_s24 + $0x20] sm:$0xff] %vm242_vm0, %v823_v59  ;;  %v614_v40 = vadd.f32 %v598_v29, %v562_v30  ;;  %v508_v47 = vadd.f32 %v492_v32, %v456_v31  ;;  %v441_v49 = vmul.f32 %v735_v50, %v2010_v43  ;;  %v705_v18 = vmul.f32 %v2022_v57, %v685_v8  ;;  %v791_v29 = vld [vmem:[#allocation2 + $0x92] sm:$0xff] }
  0x97   : > { %v772_v19 = vadd.f32 %v756_v16, %v720_v35  ;;  %v757_v38 = vmul.f32 %v2026_v60, %v737_v22  ;;  %v599_v37 = vmul.f32 %v736_v13, %v2018_v52  ;;  %v493_v0 = vmul.f32 %v787_v63, %v2012_v44 }
  0x98   : > { %v666_v53 = vadd.f32 %v650_v28, %v614_v40  ;;  %v563_v54 = vadd.f32 %v547_v39, %v508_v47  ;;  %v457_v62 = vadd.f32 %v441_v49, %v405_v48  ;;  %v809_v4 = vmul.f32 %v2029_v2, %v789_v45  ;;  %v688_v40 = vld [vmem:[#allocation2 + $0x98] sm:$0xff] }
  0x99   : > { %v824_v3 = vadd.f32 %v808_v36, %v772_v19  ;;  %v651_v50 = vmul.f32 %v788_v23, %v2020_v55  ;;  %v390_v26 = vmul.f32 %v684_v5, %v2008_v42  ;;  %v548_v34 = vmul.f32 %v685_v8, %v2016_v51 }
  0x9a   : > { %v721_v6 = vadd.f32 %v705_v18, %v666_v53  ;;  %v615_v7 = vadd.f32 %v599_v37, %v563_v54  ;;  %v509_v10 = vadd.f32 %v493_v0, %v457_v62  ;;  %v706_v11 = vmul.f32 %v2022_v57, %v686_v58  ;;  %v740_v18 = vld [vmem:[#allocation2 + $0x99] sm:$0xff] }
  0x9b   : > { %842 = vst.msk [vmem:[%s2089_s24 + $0x28] sm:$0xff] %vm242_vm0, %v824_v3  ;;  %v758_v14 = vmul.f32 %v2026_v60, %v738_v61  ;;  %v406_v63 = vadd.f32 %v2006_v41, %v390_v26  ;;  %v442_v56 = vmul.f32 %v736_v13, %v2010_v43  ;;  %v600_v5 = vmul.f32 %v737_v22, %v2018_v52 }
  0x9c   : > { %v773_v12 = vadd.f32 %v757_v38, %v721_v6  ;;  %v667_v15 = vadd.f32 %v651_v50, %v615_v7  ;;  %v564_v20 = vadd.f32 %v548_v34, %v509_v10  ;;  %v810_v46 = vmul.f32 %v2029_v2, %v790_v9  ;;  %v689_v34 = vld [vmem:[#allocation2 + $0xa8] sm:$0xff] }
  0x9d   : > { %v458_v1 = vadd.f32 %v442_v56, %v406_v63  ;;  %v494_v17 = vmul.f32 %v788_v23, %v2012_v44  ;;  %v391_v25 = vmul.f32 %v685_v8, %v2008_v42  ;;  %v652_v13 = vmul.f32 %v789_v45, %v2020_v55 }
  0x9e   : > { %v825_v59 = vadd.f32 %v809_v4, %v773_v12  ;;  %v722_v27 = vadd.f32 %v706_v11, %v667_v15  ;;  %v616_v16 = vadd.f32 %v600_v5, %v564_v20  ;;  %v549_v31 = vmul.f32 %v686_v58, %v2016_v51  ;;  %v792_v4 = vld [vmem:[#allocation2 + $0x9a] sm:$0xff]  ;;  %v741_v11 = vld [vmem:[#allocation2 + $0xa9] sm:$0xff] }
  0x9f   : > { %v510_v30 = vadd.f32 %v494_v17, %v458_v1  ;;  %v407_v32 = vadd.f32 %v2006_v41, %v391_v25  ;;  %v443_v33 = vmul.f32 %v737_v22, %v2010_v43  ;;  %v707_v23 = vmul.f32 %v2022_v57, %v687_v21  ;;  %v793_v5 = vld [vmem:[#allocation2 + $0xaa] sm:$0xff] }
  0xa0   : > { %843 = vst.msk [vmem:[%s2089_s24 + $0x30] sm:$0xff] %vm242_vm0, %v825_v59  ;;  %v774_v35 = vadd.f32 %v758_v14, %v722_v27  ;;  %v668_v36 = vadd.f32 %v652_v13, %v616_v16  ;;  %v759_v8 = vmul.f32 %v2026_v60, %v739_v24  ;;  %v601_v39 = vmul.f32 %v738_v61, %v2018_v52 }
  0xa1   : > { %v565_v28 = vadd.f32 %v549_v31, %v510_v30  ;;  %v459_v47 = vadd.f32 %v443_v33, %v407_v32  ;;  %v495_v48 = vmul.f32 %v789_v45, %v2012_v44  ;;  %v811_v22 = vmul.f32 %v2029_v2, %v791_v29  ;;  %v690_v30 = vld [vmem:[#allocation2 + $0xb0] sm:$0xff] }
  0xa2   : > { %v826_v49 = vadd.f32 %v810_v46, %v774_v35  ;;  %v723_v19 = vadd.f32 %v707_v23, %v668_v36  ;;  %v392_v38 = vmul.f32 %v686_v58, %v2008_v42  ;;  %v653_v53 = vmul.f32 %v790_v9, %v2020_v55  ;;  %v742_v23 = vld [vmem:[#allocation2 + $0xb1] sm:$0xff] }
  0xa3   : > { %v617_v37 = vadd.f32 %v601_v39, %v565_v28  ;;  %v511_v54 = vadd.f32 %v495_v48, %v459_v47  ;;  %v550_v62 = vmul.f32 %v687_v21, %v2016_v51  ;;  %v708_v3 = vmul.f32 %v2022_v57, %v688_v40 }
  0xa4   : > { %844 = vst.msk [vmem:[%s2089_s24 + $0x38] sm:$0xff] %vm242_vm0, %v826_v49  ;;  %v775_v0 = vadd.f32 %v759_v8, %v723_v19  ;;  %v408_v45 = vadd.f32 %v2006_v41, %v392_v38  ;;  %v444_v50 = vmul.f32 %v738_v61, %v2010_v43  ;;  %v760_v58 = vmul.f32 %v2026_v60, %v740_v18  ;;  %v794_v19 = vld [vmem:[#allocation2 + $0xb2] sm:$0xff] }
  0xa5   : > { %v669_v26 = vadd.f32 %v653_v53, %v617_v37  ;;  %v566_v6 = vadd.f32 %v550_v62, %v511_v54  ;;  %v602_v7 = vmul.f32 %v739_v24, %v2018_v52  ;;  %v496_v63 = vmul.f32 %v790_v9, %v2012_v44  ;;  %v691_v62 = vld [vmem:[#allocation2 + $0xc0] sm:$0xff] }
  0xa6   : > { %v827_v10 = vadd.f32 %v811_v22, %v775_v0  ;;  %v460_v14 = vadd.f32 %v444_v50, %v408_v45  ;;  %v393_v56 = vmul.f32 %v687_v21, %v2008_v42  ;;  %v812_v15 = vmul.f32 %v2029_v2, %v792_v4  ;;  %v743_v0 = vld [vmem:[#allocation2 + $0xc1] sm:$0xff] }
  0xa7   : > { %v724_v12 = vadd.f32 %v708_v3, %v669_v26  ;;  %v618_v20 = vadd.f32 %v602_v7, %v566_v6  ;;  %v654_v61 = vmul.f32 %v791_v29, %v2020_v55  ;;  %v551_v1 = vmul.f32 %v688_v40, %v2016_v51  ;;  %v795_v7 = vld [vmem:[#allocation2 + $0xc2] sm:$0xff] }
  0xa8   : > { %845 = vst.msk [vmem:[%s2089_s24 + $0x40] sm:$0xff] %vm242_vm0, %v827_v10  ;;  %v512_v46 = vadd.f32 %v496_v63, %v460_v14  ;;  %v409_v17 = vadd.f32 %v2006_v41, %v393_v56  ;;  %v445_v25 = vmul.f32 %v739_v24, %v2010_v43  ;;  %v709_v21 = vmul.f32 %v2022_v57, %v689_v34 }
  0xa9   : > { %v776_v59 = vadd.f32 %v760_v58, %v724_v12  ;;  %v670_v9 = vadd.f32 %v654_v61, %v618_v20  ;;  %v761_v27 = vmul.f32 %v2026_v60, %v741_v11  ;;  %v603_v13 = vmul.f32 %v740_v18, %v2018_v52 }
  0xaa   : > { %v567_v16 = vadd.f32 %v551_v1, %v512_v46  ;;  %v461_v31 = vadd.f32 %v445_v25, %v409_v17  ;;  %v497_v32 = vmul.f32 %v791_v29, %v2012_v44  ;;  %v813_v36 = vmul.f32 %v2029_v2, %v793_v5  ;;  %v692_v46 = vld [vmem:[#allocation2 + $0xc8] sm:$0xff] }
  0xab   : > { %v828_v33 = vadd.f32 %v812_v15, %v776_v59  ;;  %v725_v35 = vadd.f32 %v709_v21, %v670_v9  ;;  %v394_v24 = vmul.f32 %v688_v40, %v2008_v42  ;;  %v655_v28 = vmul.f32 %v792_v4, %v2020_v55  ;;  %v744_v21 = vld [vmem:[#allocation2 + $0xc9] sm:$0xff] }
  0xac   : > { %v619_v8 = vadd.f32 %v603_v13, %v567_v16  ;;  %v513_v39 = vadd.f32 %v497_v32, %v461_v31  ;;  %v552_v47 = vmul.f32 %v689_v34, %v2016_v51  ;;  %v710_v49 = vmul.f32 %v2022_v57, %v690_v30 }
  0xad   : > { %846 = vst.msk [vmem:[%s2089_s24 + $0x48] sm:$0xff] %vm242_vm0, %v828_v33  ;;  %v777_v48 = vadd.f32 %v761_v27, %v725_v35  ;;  %v410_v29 = vadd.f32 %v2006_v41, %v394_v24  ;;  %v446_v22 = vmul.f32 %v740_v18, %v2010_v43  ;;  %v762_v40 = vmul.f32 %v2026_v60, %v742_v23  ;;  %v796_v35 = vld [vmem:[#allocation2 + $0xca] sm:$0xff] }
  0xae   : > { %v671_v38 = vadd.f32 %v655_v28, %v619_v8  ;;  %v568_v37 = vadd.f32 %v552_v47, %v513_v39  ;;  %v604_v53 = vmul.f32 %v741_v11, %v2018_v52  ;;  %v498_v45 = vmul.f32 %v792_v4, %v2012_v44  ;;  %v693_v47 = vld [vmem:[#allocation2 + $0xd8] sm:$0xff] }
  0xaf   : > { %v829_v54 = vadd.f32 %v813_v36, %v777_v48  ;;  %v462_v3 = vadd.f32 %v446_v22, %v410_v29  ;;  %v395_v50 = vmul.f32 %v689_v34, %v2008_v42  ;;  %v814_v58 = vmul.f32 %v2029_v2, %v794_v19  ;;  %v745_v48 = vld [vmem:[#allocation2 + $0xd9] sm:$0xff] }
  0xb0   : > { %v726_v26 = vadd.f32 %v710_v49, %v671_v38  ;;  %v620_v6 = vadd.f32 %v604_v53, %v568_v37  ;;  %v656_v18 = vmul.f32 %v793_v5, %v2020_v55  ;;  %v553_v14 = vmul.f32 %v690_v30, %v2016_v51  ;;  %v797_v53 = vld [vmem:[#allocation2 + $0xda] sm:$0xff] }
  0xb1   : > { %847 = vst.msk [vmem:[%s2089_s24 + $0x50] sm:$0xff] %vm242_vm0, %v829_v54  ;;  %v514_v10 = vadd.f32 %v498_v45, %v462_v3  ;;  %v411_v63 = vadd.f32 %v2006_v41, %v395_v50  ;;  %v447_v56 = vmul.f32 %v741_v11, %v2010_v43  ;;  %v711_v34 = vmul.f32 %v2022_v57, %v691_v62 }
  0xb2   : > { %v778_v12 = vadd.f32 %v762_v40, %v726_v26  ;;  %v672_v4 = vadd.f32 %v656_v18, %v620_v6  ;;  %v763_v15 = vmul.f32 %v2026_v60, %v743_v0  ;;  %v605_v61 = vmul.f32 %v742_v23, %v2018_v52 }
  0xb3   : > { %v569_v20 = vadd.f32 %v553_v14, %v514_v10  ;;  %v463_v1 = vadd.f32 %v447_v56, %v411_v63  ;;  %v499_v17 = vmul.f32 %v793_v5, %v2012_v44  ;;  %v815_v9 = vmul.f32 %v2029_v2, %v795_v7  ;;  %v694_v10 = vld [vmem:[#allocation2 + $0xe0] sm:$0xff] }
  0xb4   : > { %v830_v25 = vadd.f32 %v814_v58, %v778_v12  ;;  %v727_v59 = vadd.f32 %v711_v34, %v672_v4  ;;  %v396_v11 = vmul.f32 %v690_v30, %v2008_v42  ;;  %v657_v16 = vmul.f32 %v794_v19, %v2020_v55  ;;  %v746_v34 = vld [vmem:[#allocation2 + $0xe1] sm:$0xff] }
  0xb5   : > { %v621_v27 = vadd.f32 %v605_v61, %v569_v20  ;;  %v515_v13 = vadd.f32 %v499_v17, %v463_v1  ;;  %v554_v31 = vmul.f32 %v691_v62, %v2016_v51  ;;  %v712_v33 = vmul.f32 %v2022_v57, %v692_v46 }
  0xb6   : > { %848 = vst.msk [vmem:[%s2089_s24 + $0x58] sm:$0xff] %vm242_vm0, %v830_v25  ;;  %v779_v32 = vadd.f32 %v763_v15, %v727_v59  ;;  %v412_v5 = vadd.f32 %v2006_v41, %v396_v11  ;;  %v448_v36 = vmul.f32 %v742_v23, %v2010_v43  ;;  %v764_v30 = vmul.f32 %v2026_v60, %v744_v21  ;;  %v798_v59 = vld [vmem:[#allocation2 + $0xe2] sm:$0xff] }
  0xb7   : > { %v673_v24 = vadd.f32 %v657_v16, %v621_v27  ;;  %v570_v8 = vadd.f32 %v554_v31, %v515_v13  ;;  %v606_v28 = vmul.f32 %v743_v0, %v2018_v52  ;;  %v500_v29 = vmul.f32 %v794_v19, %v2012_v44  ;;  %v1149_v31 = vld [vmem:[#allocation2 + $0xf0] sm:$0xff] }
  0xb8   : > { %v831_v39 = vadd.f32 %v815_v9, %v779_v32  ;;  %v464_v49 = vadd.f32 %v448_v36, %v412_v5  ;;  %v871_v22 = vmul.f32 %v691_v62, %v2008_v42  ;;  %v816_v40 = vmul.f32 %v2029_v2, %v796_v35  ;;  %v1197_v32 = vld [vmem:[#allocation2 + $0xf1] sm:$0xff] }
  0xb9   : > { %v728_v38 = vadd.f32 %v712_v33, %v673_v24  ;;  %v622_v37 = vadd.f32 %v606_v28, %v570_v8  ;;  %v658_v23 = vmul.f32 %v795_v7, %v2020_v55  ;;  %v555_v3 = vmul.f32 %v692_v46, %v2016_v51  ;;  %v1245_v28 = vld [vmem:[#allocation2 + $0xf2] sm:$0xff] }
  0xba   : > { %849 = vst.msk [vmem:[%s2089_s24 + $0x60] sm:$0xff] %vm242_vm0, %v831_v39  ;;  %v516_v54 = vadd.f32 %v500_v29, %v464_v49  ;;  %v887_v45 = vadd.f32 %v2006_v41, %v871_v22  ;;  %v919_v50 = vmul.f32 %v743_v0, %v2010_v43  ;;  %v713_v62 = vmul.f32 %v2022_v57, %v693_v47 }
  0xbb   : > { %v780_v26 = vadd.f32 %v764_v30, %v728_v38  ;;  %v674_v19 = vadd.f32 %v658_v23, %v622_v37  ;;  %v765_v58 = vmul.f32 %v2026_v60, %v745_v48  ;;  %v607_v18 = vmul.f32 %v744_v21, %v2018_v52 }
  0xbc   : > { %v571_v6 = vadd.f32 %v555_v3, %v516_v54  ;;  %v935_v14 = vadd.f32 %v919_v50, %v887_v45  ;;  %v967_v63 = vmul.f32 %v795_v7, %v2012_v44  ;;  %v817_v4 = vmul.f32 %v2029_v2, %v797_v53  ;;  %v1150_v54 = vld [vmem:[#allocation2 + $0xf8] sm:$0xff] }
  0xbd   : > { %v832_v56 = vadd.f32 %v816_v40, %v780_v26  ;;  %v729_v12 = vadd.f32 %v713_v62, %v674_v19  ;;  %v872_v0 = vmul.f32 %v692_v46, %v2008_v42  ;;  %v659_v20 = vmul.f32 %v796_v35, %v2020_v55  ;;  %v1198_v62 = vld [vmem:[#allocation2 + $0xf9] sm:$0xff] }
  0xbe   : > { %v623_v15 = vadd.f32 %v607_v18, %v571_v6  ;;  %v983_v61 = vadd.f32 %v967_v63, %v935_v14  ;;  %v1018_v1 = vmul.f32 %v693_v47, %v2016_v51  ;;  %v714_v25 = vmul.f32 %v2022_v57, %v694_v10 }
  0xbf   : > { %850 = vst.msk [vmem:[%s2089_s24 + $0x68] sm:$0xff] %vm242_vm0, %v832_v56  ;;  %v781_v17 = vadd.f32 %v765_v58, %v729_v12  ;;  %v888_v7 = vadd.f32 %v2006_v41, %v872_v0  ;;  %v920_v9 = vmul.f32 %v744_v21, %v2010_v43  ;;  %v766_v46 = vmul.f32 %v2026_v60, %v746_v34  ;;  %v1246_v12 = vld [vmem:[#allocation2 + $0xfa] sm:$0xff] }
  0xc0   : > { %v675_v11 = vadd.f32 %v659_v20, %v623_v15  ;;  %v1034_v27 = vadd.f32 %v1018_v1, %v983_v61  ;;  %v1066_v16 = vmul.f32 %v745_v48, %v2018_v52  ;;  %v968_v5 = vmul.f32 %v796_v35, %v2012_v44  ;;  %v1151_v1 = vld [vmem:[#allocation2 + $0x108] sm:$0xff] }
  0xc1   : > { %v833_v13 = vadd.f32 %v817_v4, %v781_v17  ;;  %v936_v33 = vadd.f32 %v920_v9, %v888_v7  ;;  %v873_v36 = vmul.f32 %v693_v47, %v2008_v42  ;;  %v818_v30 = vmul.f32 %v2029_v2, %v798_v59  ;;  %v1199_v17 = vld [vmem:[#allocation2 + $0x109] sm:$0xff] }
  0xc2   : > { %v730_v24 = vadd.f32 %v714_v25, %v675_v11  ;;  %v1082_v8 = vadd.f32 %v1066_v16, %v1034_v27  ;;  %v1114_v21 = vmul.f32 %v797_v53, %v2020_v55  ;;  %v1019_v49 = vmul.f32 %v694_v10, %v2016_v51  ;;  %v1247_v16 = vld [vmem:[#allocation2 + $0x10a] sm:$0xff] }
  0xc3   : > { %851 = vst.msk [vmem:[%s2089_s24 + $0x70] sm:$0xff] %vm242_vm0, %v833_v13  ;;  %v984_v39 = vadd.f32 %v968_v5, %v936_v33  ;;  %v889_v29 = vadd.f32 %v2006_v41, %v873_v36  ;;  %v921_v22 = vmul.f32 %v745_v48, %v2010_v43  ;;  %v1165_v47 = vmul.f32 %v1149_v31, %v2022_v57 }
  0xc4   : > { %v782_v38 = vadd.f32 %v766_v46, %v730_v24  ;;  %v1130_v35 = vadd.f32 %v1114_v21, %v1082_v8  ;;  %v1213_v40 = vmul.f32 %v1197_v32, %v2026_v60  ;;  %v1067_v23 = vmul.f32 %v746_v34, %v2018_v52 }
  0xc5   : > { %v1035_v37 = vadd.f32 %v1019_v49, %v984_v39  ;;  %v937_v3 = vadd.f32 %v921_v22, %v889_v29  ;;  %v969_v45 = vmul.f32 %v797_v53, %v2012_v44  ;;  %v1261_v19 = vmul.f32 %v1245_v28, %v2029_v2  ;;  %v1152_v39 = vld [vmem:[#allocation2 + $0x110] sm:$0xff] }
  0xc6   : > { %v834_v50 = vadd.f32 %v818_v30, %v782_v38  ;;  %v1181_v26 = vadd.f32 %v1165_v47, %v1130_v35  ;;  %v874_v48 = vmul.f32 %v694_v10, %v2008_v42  ;;  %v1115_v6 = vmul.f32 %v798_v59, %v2020_v55  ;;  %v1200_v47 = vld [vmem:[#allocation2 + $0x111] sm:$0xff] }
  0xc7   : > { %v1083_v58 = vadd.f32 %v1067_v23, %v1035_v37  ;;  %v985_v18 = vadd.f32 %v969_v45, %v937_v3  ;;  %v1020_v14 = vmul.f32 %v1149_v31, %v2016_v51  ;;  %v1166_v56 = vmul.f32 %v1150_v54, %v2022_v57 }
  0xc8   : > { %852 = vst.msk [vmem:[%s2089_s24 + $0x78] sm:$0xff] %vm242_vm0, %v834_v50  ;;  %v1229_v63 = vadd.f32 %v1213_v40, %v1181_v26  ;;  %v890_v53 = vadd.f32 %v2006_v41, %v874_v48  ;;  %v922_v4 = vmul.f32 %v746_v34, %v2010_v43  ;;  %v1214_v10 = vmul.f32 %v1198_v62, %v2026_v60  ;;  %v1248_v26 = vld [vmem:[#allocation2 + $0x112] sm:$0xff] }
  0xc9   : > { %v1131_v0 = vadd.f32 %v1115_v6, %v1083_v58  ;;  %v1036_v15 = vadd.f32 %v1020_v14, %v985_v18  ;;  %v1068_v20 = vmul.f32 %v1197_v32, %v2018_v52  ;;  %v970_v7 = vmul.f32 %v798_v59, %v2012_v44  ;;  %v1153_v14 = vld [vmem:[#allocation2 + $0x120] sm:$0xff] }
  0xca   : > { %v1277_v61 = vadd.f32 %v1261_v19, %v1229_v63  ;;  %v938_v25 = vadd.f32 %v922_v4, %v890_v53  ;;  %v875_v9 = vmul.f32 %v1149_v31, %v2008_v42  ;;  %v1262_v46 = vmul.f32 %v1246_v12, %v2029_v2  ;;  %v1201_v63 = vld [vmem:[#allocation2 + $0x121] sm:$0xff] }
  0xcb   : > { %v1182_v11 = vadd.f32 %v1166_v56, %v1131_v0  ;;  %v1084_v27 = vadd.f32 %v1068_v20, %v1036_v15  ;;  %v1116_v34 = vmul.f32 %v1245_v28, %v2020_v55  ;;  %v1021_v33 = vmul.f32 %v1150_v54, %v2016_v51  ;;  %v1249_v20 = vld [vmem:[#allocation2 + $0x122] sm:$0xff] }
  0xcc   : > { %1455 = vst.msk [vmem:[%s2089_s24 + $0x80] sm:$0xff] %vm242_vm0, %v1277_v61  ;;  %v986_v13 = vadd.f32 %v970_v7, %v938_v25  ;;  %v891_v5 = vadd.f32 %v2006_v41, %v875_v9  ;;  %v923_v36 = vmul.f32 %v1197_v32, %v2010_v43  ;;  %v1167_v31 = vmul.f32 %v1151_v1, %v2022_v57 }
  0xcd   : > { %v1230_v24 = vadd.f32 %v1214_v10, %v1182_v11  ;;  %v1132_v59 = vadd.f32 %v1116_v34, %v1084_v27  ;;  %v1215_v30 = vmul.f32 %v1199_v17, %v2026_v60  ;;  %v1069_v21 = vmul.f32 %v1198_v62, %v2018_v52 }
  0xce   : > { %v1037_v8 = vadd.f32 %v1021_v33, %v986_v13  ;;  %v939_v49 = vadd.f32 %v923_v36, %v891_v5  ;;  %v971_v29 = vmul.f32 %v1245_v28, %v2012_v44  ;;  %v1263_v35 = vmul.f32 %v1247_v16, %v2029_v2  ;;  %v1154_v13 = vld [vmem:[#allocation2 + $0x128] sm:$0xff] }
  0xcf   : > { %v1278_v22 = vadd.f32 %v1262_v46, %v1230_v24  ;;  %v1183_v38 = vadd.f32 %v1167_v31, %v1132_v59  ;;  %v876_v32 = vmul.f32 %v1150_v54, %v2008_v42  ;;  %v1117_v37 = vmul.f32 %v1246_v12, %v2020_v55  ;;  %v1202_v31 = vld [vmem:[#allocation2 + $0x129] sm:$0xff] }
  0xd0   : > { %v1085_v40 = vadd.f32 %v1069_v21, %v1037_v8  ;;  %v987_v23 = vadd.f32 %v971_v29, %v939_v49  ;;  %v1022_v3 = vmul.f32 %v1151_v1, %v2016_v51  ;;  %v1168_v50 = vmul.f32 %v1152_v39, %v2022_v57 }
  0xd1   : > { %1456 = vst.msk [vmem:[%s2089_s24 + $0x88] sm:$0xff] %vm242_vm0, %v1278_v22  ;;  %v1231_v45 = vadd.f32 %v1215_v30, %v1183_v38  ;;  %v892_v28 = vadd.f32 %v2006_v41, %v876_v32  ;;  %v924_v19 = vmul.f32 %v1198_v62, %v2010_v43  ;;  %v1216_v54 = vmul.f32 %v1200_v47, %v2026_v60  ;;  %v1250_v38 = vld [vmem:[#allocation2 + $0x12a] sm:$0xff] }
  0xd2   : > { %v1133_v48 = vadd.f32 %v1117_v37, %v1085_v40  ;;  %v1038_v58 = vadd.f32 %v1022_v3, %v987_v23  ;;  %v1070_v6 = vmul.f32 %v1199_v17, %v2018_v52  ;;  %v972_v53 = vmul.f32 %v1246_v12, %v2012_v44  ;;  %v1155_v3 = vld [vmem:[#allocation2 + $0x138] sm:$0xff] }
  0xd3   : > { %v1279_v18 = vadd.f32 %v1263_v35, %v1231_v45  ;;  %v940_v56 = vadd.f32 %v924_v19, %v892_v28  ;;  %v877_v4 = vmul.f32 %v1151_v1, %v2008_v42  ;;  %v1264_v10 = vmul.f32 %v1248_v26, %v2029_v2  ;;  %v1203_v45 = vld [vmem:[#allocation2 + $0x139] sm:$0xff] }
  0xd4   : > { %v1184_v0 = vadd.f32 %v1168_v50, %v1133_v48  ;;  %v1086_v15 = vadd.f32 %v1070_v6, %v1038_v58  ;;  %v1118_v62 = vmul.f32 %v1247_v16, %v2020_v55  ;;  %v1023_v25 = vmul.f32 %v1152_v39, %v2016_v51  ;;  %v1251_v58 = vld [vmem:[#allocation2 + $0x13a] sm:$0xff] }
  0xd5   : > { %1457 = vst.msk [vmem:[%s2089_s24 + $0x90] sm:$0xff] %vm242_vm0, %v1279_v18  ;;  %v988_v61 = vadd.f32 %v972_v53, %v940_v56  ;;  %v893_v7 = vadd.f32 %v2006_v41, %v877_v4  ;;  %v925_v9 = vmul.f32 %v1199_v17, %v2010_v43  ;;  %v1169_v1 = vmul.f32 %v1153_v14, %v2022_v57  ;;  %v2333_v56 = vld [vmem:[%s2502_s2] ss:$0 sm:$0xff] }
  0xd6   : > { %v1232_v11 = vadd.f32 %v1216_v54, %v1184_v0  ;;  %v1134_v12 = vadd.f32 %v1118_v62, %v1086_v15  ;;  %v1217_v46 = vmul.f32 %v1201_v63, %v2026_v60  ;;  %v1071_v34 = vmul.f32 %v1200_v47, %v2018_v52 }
  0xd7   : > { %v1039_v27 = vadd.f32 %v1023_v25, %v988_v61  ;;  %v941_v33 = vadd.f32 %v925_v9, %v893_v7  ;;  %v973_v5 = vmul.f32 %v1247_v16, %v2012_v44  ;;  %v1265_v59 = vmul.f32 %v1249_v20, %v2029_v2  ;;  %v1156_v61 = vld [vmem:[#allocation2 + $0x140] sm:$0xff] }
  0xd8   : > { %v1280_v36 = vadd.f32 %v1264_v10, %v1232_v11  ;;  %v1185_v24 = vadd.f32 %v1169_v1, %v1134_v12  ;;  %v878_v17 = vmul.f32 %v1152_v39, %v2008_v42  ;;  %v1119_v8 = vmul.f32 %v1248_v26, %v2020_v55  ;;  %v1204_v1 = vld [vmem:[#allocation2 + $0x141] sm:$0xff] }
  0xd9   : > { %v1087_v30 = vadd.f32 %v1071_v34, %v1039_v27  ;;  %v989_v21 = vadd.f32 %v973_v5, %v941_v33  ;;  %v1024_v49 = vmul.f32 %v1153_v14, %v2016_v51  ;;  %v1170_v22 = vmul.f32 %v1154_v13, %v2022_v57 }
  0xda   : > { %1458 = vst.msk [vmem:[%s2089_s24 + $0x98] sm:$0xff] %vm242_vm0, %v1280_v36  ;;  %v1233_v29 = vadd.f32 %v1217_v46, %v1185_v24  ;;  %v894_v16 = vadd.f32 %v2006_v41, %v878_v17  ;;  %v926_v35 = vmul.f32 %v1200_v47, %v2010_v43  ;;  %v1218_v39 = vmul.f32 %v1202_v31, %v2026_v60  ;;  %v1252_v24 = vld [vmem:[#allocation2 + $0x142] sm:$0xff] }
  0xdb   : > { %v1135_v32 = vadd.f32 %v1119_v8, %v1087_v30  ;;  %v1040_v40 = vadd.f32 %v1024_v49, %v989_v21  ;;  %v1072_v37 = vmul.f32 %v1201_v63, %v2018_v52  ;;  %v974_v28 = vmul.f32 %v1248_v26, %v2012_v44  ;;  %v1157_v49 = vld [vmem:[#allocation2 + $0x150] sm:$0xff] }
  0xdc   : > { %v1281_v23 = vadd.f32 %v1265_v59, %v1233_v29  ;;  %v942_v50 = vadd.f32 %v926_v35, %v894_v16  ;;  %v879_v19 = vmul.f32 %v1153_v14, %v2008_v42  ;;  %v1266_v41 = vmul.f32 %v1250_v38, %v2029_v2  ;;  %v1205_v29 = vld [vmem:[#allocation2 + $0x151] sm:$0xff] }
  0xdd   : > { %v1186_v48 = vadd.f32 %v1170_v22, %v1135_v32  ;;  %v1088_v54 = vadd.f32 %v1072_v37, %v1040_v40  ;;  %v1120_v47 = vmul.f32 %v1249_v20, %v2020_v55  ;;  %v1025_v18 = vmul.f32 %v1154_v13, %v2016_v51  ;;  %v1253_v37 = vld [vmem:[#allocation2 + $0x152] sm:$0xff] }
  0xde   : > { %1459 = vst.msk [vmem:[%s2089_s24 + $0xa0] sm:$0xff] %vm242_vm0, %v1281_v23  ;;  %v990_v6 = vadd.f32 %v974_v28, %v942_v50  ;;  %v895_v26 = vadd.f32 %v2333_v56, %v879_v19  ;;  %v927_v14 = vmul.f32 %v1201_v63, %v2010_v43  ;;  %v1171_v0 = vmul.f32 %v1155_v3, %v2022_v57 }
  0xdf   : > { %v1234_v53 = vadd.f32 %v1218_v39, %v1186_v48  ;;  %v1136_v4 = vadd.f32 %v1120_v47, %v1088_v54  ;;  %v1219_v10 = vmul.f32 %v1203_v45, %v2026_v60  ;;  %v1073_v62 = vmul.f32 %v1202_v31, %v2018_v52 }
  0xe0   : > { %v1041_v15 = vadd.f32 %v1025_v18, %v990_v6  ;;  %v943_v25 = vadd.f32 %v927_v14, %v895_v26  ;;  %v975_v7 = vmul.f32 %v1249_v20, %v2012_v44  ;;  %v1267_v12 = vmul.f32 %v1251_v58, %v2029_v2  ;;  %v1158_v6 = vld [vmem:[#allocation2 + $0x158] sm:$0xff] }
  0xe1   : > { %v1282_v9 = vadd.f32 %v1266_v41, %v1234_v53  ;;  %v1187_v11 = vadd.f32 %v1171_v0, %v1136_v4  ;;  %v880_v63 = vmul.f32 %v1154_v13, %v2008_v42  ;;  %v1121_v27 = vmul.f32 %v1250_v38, %v2020_v55  ;;  %v1206_v0 = vld [vmem:[#allocation2 + $0x159] sm:$0xff] }
  0xe2   : > { %v1089_v46 = vadd.f32 %v1073_v62, %v1041_v15  ;;  %v991_v34 = vadd.f32 %v975_v7, %v943_v25  ;;  %v1026_v33 = vmul.f32 %v1155_v3, %v2016_v51  ;;  %v1172_v36 = vmul.f32 %v1156_v61, %v2022_v57 }
  0xe3   : > { %1460 = vst.msk [vmem:[%s2089_s24 + $0xa8] sm:$0xff] %vm242_vm0, %v1282_v9  ;;  %v1235_v5 = vadd.f32 %v1219_v10, %v1187_v11  ;;  %v896_v20 = vadd.f32 %v2333_v56, %v880_v63  ;;  %v928_v59 = vmul.f32 %v1202_v31, %v2010_v43  ;;  %v1220_v13 = vmul.f32 %v1204_v1, %v2026_v60  ;;  %v1254_v11 = vld [vmem:[#allocation2 + $0x15a] sm:$0xff] }
  0xe4   : > { %v1137_v17 = vadd.f32 %v1121_v27, %v1089_v46  ;;  %v1042_v30 = vadd.f32 %v1026_v33, %v991_v34  ;;  %v1074_v8 = vmul.f32 %v1203_v45, %v2018_v52  ;;  %v976_v16 = vmul.f32 %v1250_v38, %v2012_v44  ;;  %v1159_v33 = vld [vmem:[#allocation2 + $0x168] sm:$0xff] }
  0xe5   : > { %v1283_v21 = vadd.f32 %v1267_v12, %v1235_v5  ;;  %v944_v22 = vadd.f32 %v928_v59, %v896_v20  ;;  %v881_v35 = vmul.f32 %v1155_v3, %v2008_v42  ;;  %v1268_v39 = vmul.f32 %v1252_v24, %v2029_v2  ;;  %v1207_v5 = vld [vmem:[#allocation2 + $0x169] sm:$0xff] }
  0xe6   : > { %v1188_v32 = vadd.f32 %v1172_v36, %v1137_v17  ;;  %v1090_v40 = vadd.f32 %v1074_v8, %v1042_v30  ;;  %v1122_v31 = vmul.f32 %v1251_v58, %v2020_v55  ;;  %v1027_v50 = vmul.f32 %v1156_v61, %v2016_v51  ;;  %v1255_v8 = vld [vmem:[#allocation2 + $0x16a] sm:$0xff] }
  0xe7   : > { %1461 = vst.msk [vmem:[%s2089_s24 + $0xb0] sm:$0xff] %vm242_vm0, %v1283_v21  ;;  %v992_v23 = vadd.f32 %v976_v16, %v944_v22  ;;  %v897_v28 = vadd.f32 %v2333_v56, %v881_v35  ;;  %v929_v19 = vmul.f32 %v1203_v45, %v2010_v43  ;;  %v1173_v3 = vmul.f32 %v1157_v49, %v2022_v57 }
  0xe8   : > { %v1236_v48 = vadd.f32 %v1220_v13, %v1188_v32  ;;  %v1138_v38 = vadd.f32 %v1122_v31, %v1090_v40  ;;  %v1221_v41 = vmul.f32 %v1205_v29, %v2026_v60  ;;  %v1075_v47 = vmul.f32 %v1204_v1, %v2018_v52 }
  0xe9   : > { %v1043_v54 = vadd.f32 %v1027_v50, %v992_v23  ;;  %v945_v18 = vadd.f32 %v929_v19, %v897_v28  ;;  %v977_v26 = vmul.f32 %v1251_v58, %v2012_v44  ;;  %v1269_v4 = vmul.f32 %v1253_v37, %v2029_v2  ;;  %v1160_v23 = vld [vmem:[#allocation2 + $0x170] sm:$0xff] }
  0xea   : > { %v1284_v14 = vadd.f32 %v1268_v39, %v1236_v48  ;;  %v1189_v53 = vadd.f32 %v1173_v3, %v1138_v38  ;;  %v882_v45 = vmul.f32 %v1156_v61, %v2008_v42  ;;  %v1123_v15 = vmul.f32 %v1252_v24, %v2020_v55  ;;  %v1208_v3 = vld [vmem:[#allocation2 + $0x171] sm:$0xff] }
  0xeb   : > { %v1091_v10 = vadd.f32 %v1075_v47, %v1043_v54  ;;  %v993_v62 = vadd.f32 %v977_v26, %v945_v18  ;;  %v1028_v25 = vmul.f32 %v1157_v49, %v2016_v51  ;;  %v1174_v9 = vmul.f32 %v1158_v6, %v2022_v57 }
  0xec   : > { %1462 = vst.msk [vmem:[%s2089_s24 + $0xb8] sm:$0xff] %vm242_vm0, %v1284_v14  ;;  %v1237_v7 = vadd.f32 %v1221_v41, %v1189_v53  ;;  %v898_v58 = vadd.f32 %v2333_v56, %v882_v45  ;;  %v930_v12 = vmul.f32 %v1204_v1, %v2010_v43  ;;  %v1222_v61 = vmul.f32 %v1206_v0, %v2026_v60  ;;  %v1256_v53 = vld [vmem:[#allocation2 + $0x172] sm:$0xff] }
  0xed   : > { %v1139_v63 = vadd.f32 %v1123_v15, %v1091_v10  ;;  %v1044_v46 = vadd.f32 %v1028_v25, %v993_v62  ;;  %v1076_v27 = vmul.f32 %v1205_v29, %v2018_v52  ;;  %v978_v20 = vmul.f32 %v1252_v24, %v2012_v44  ;;  %v1161_v25 = vld [vmem:[#allocation2 + $0x180] sm:$0xff] }
  0xee   : > { %v1285_v34 = vadd.f32 %v1269_v4, %v1237_v7  ;;  %v946_v36 = vadd.f32 %v930_v12, %v898_v58  ;;  %v883_v59 = vmul.f32 %v1157_v49, %v2008_v42  ;;  %v1270_v13 = vmul.f32 %v1254_v11, %v2029_v2 }
  0xef   : > { %v1190_v17 = vadd.f32 %v1174_v9, %v1139_v63  ;;  %v1092_v30 = vadd.f32 %v1076_v27, %v1044_v46  ;;  %v1124_v1 = vmul.f32 %v1253_v37, %v2020_v55  ;;  %v1029_v22 = vmul.f32 %v1158_v6, %v2016_v51 }
  0xf0   : > { %1463 = vst.msk [vmem:[%s2089_s24 + $0xc0] sm:$0xff] %vm242_vm0, %v1285_v34  ;;  %v994_v21 = vadd.f32 %v978_v20, %v946_v36  ;;  %v899_v16 = vadd.f32 %v2333_v56, %v883_v59  ;;  %v931_v35 = vmul.f32 %v1205_v29, %v2010_v43  ;;  %v1175_v49 = vmul.f32 %v1159_v33, %v2022_v57 }
  0xf1   : > { %v1238_v32 = vadd.f32 %v1222_v61, %v1190_v17  ;;  %v1140_v24 = vadd.f32 %v1124_v1, %v1092_v30  ;;  %v1223_v39 = vmul.f32 %v1207_v5, %v2026_v60  ;;  %v1077_v31 = vmul.f32 %v1206_v0, %v2018_v52  ;;  %v1257_v17 = vld [vmem:[#allocation2 + $0x182] sm:$0xff] }
  0xf2   : > { %v1045_v40 = vadd.f32 %v1029_v22, %v994_v21  ;;  %v947_v50 = vadd.f32 %v931_v35, %v899_v16  ;;  %v979_v28 = vmul.f32 %v1253_v37, %v2012_v44  ;;  %v1271_v38 = vmul.f32 %v1255_v8, %v2029_v2  ;;  %v1162_v1 = vld [vmem:[#allocation2 + $0x188] sm:$0xff] }
  0xf3   : > { %v1286_v19 = vadd.f32 %v1270_v13, %v1238_v32  ;;  %v1191_v48 = vadd.f32 %v1175_v49, %v1140_v24  ;;  %v884_v29 = vmul.f32 %v1158_v6, %v2008_v42  ;;  %v1125_v54 = vmul.f32 %v1254_v11, %v2020_v55 }
  0xf4   : > { %v1093_v41 = vadd.f32 %v1077_v31, %v1045_v40  ;;  %v995_v47 = vadd.f32 %v979_v28, %v947_v50  ;;  %v1030_v18 = vmul.f32 %v1159_v33, %v2016_v51  ;;  %v1176_v14 = vmul.f32 %v1160_v23, %v2022_v57 }
  0xf5   : > { %1464 = vst.msk [vmem:[%s2089_s24 + $0xc8] sm:$0xff] %vm242_vm0, %v1286_v19  ;;  %v1239_v26 = vadd.f32 %v1223_v39, %v1191_v48  ;;  %v900_v37 = vadd.f32 %v2333_v56, %v884_v29  ;;  %v932_v4 = vmul.f32 %v1206_v0, %v2010_v43  ;;  %v1224_v6 = vmul.f32 %v1208_v3, %v2026_v60  ;;  %v1209_v0 = vld [vmem:[#allocation2 + $0x181] sm:$0xff]  ;;  %v1163_v19 = vld [vmem:[#allocation2 + $0x198] sm:$0xff] }
  0xf6   : > { %v1141_v45 = vadd.f32 %v1125_v54, %v1093_v41  ;;  %v1046_v10 = vadd.f32 %v1030_v18, %v995_v47  ;;  %v1078_v15 = vmul.f32 %v1207_v5, %v2018_v52  ;;  %v980_v9 = vmul.f32 %v1254_v11, %v2012_v44  ;;  %v1258_v47 = vld [vmem:[#allocation2 + $0x18a] sm:$0xff] }
  0xf7   : > { %v1287_v62 = vadd.f32 %v1271_v38, %v1239_v26  ;;  %v948_v7 = vadd.f32 %v932_v4, %v900_v37  ;;  %v885_v58 = vmul.f32 %v1159_v33, %v2008_v42  ;;  %v1272_v63 = vmul.f32 %v1256_v53, %v2029_v2 }
  0xf8   : > { %v1192_v12 = vadd.f32 %v1176_v14, %v1141_v45  ;;  %v1094_v61 = vadd.f32 %v1078_v15, %v1046_v10  ;;  %v1126_v46 = vmul.f32 %v1255_v8, %v2020_v55  ;;  %v1031_v34 = vmul.f32 %v1160_v23, %v2016_v51 }
  0xf9   : > { %1465 = vst.msk [vmem:[%s2089_s24 + $0xd0] sm:$0xff] %vm242_vm0, %v1287_v62  ;;  %v996_v27 = vadd.f32 %v980_v9, %v948_v7  ;;  %v901_v36 = vadd.f32 %v2333_v56, %v885_v58  ;;  %v933_v20 = vmul.f32 %v1207_v5, %v2010_v43  ;;  %v1177_v33 = vmul.f32 %v1161_v25, %v2022_v57  ;;  %v1210_v5 = vld [vmem:[#allocation2 + $0x189] sm:$0xff]  ;;  %v1164_v62 = vld [vmem:[#allocation2 + $0x1a0] sm:$0xff] }
  0xfa   : > { %v1240_v59 = vadd.f32 %v1224_v6, %v1192_v12  ;;  %v1142_v11 = vadd.f32 %v1126_v46, %v1094_v61  ;;  %v1079_v13 = vmul.f32 %v1208_v3, %v2018_v52  ;;  %v981_v22 = vmul.f32 %v1255_v8, %v2012_v44 }
  0xfb   : > { %v1047_v30 = vadd.f32 %v1031_v34, %v996_v27  ;;  %v949_v21 = vadd.f32 %v933_v20, %v901_v36  ;;  %v1032_v16 = vmul.f32 %v1161_v25, %v2016_v51  ;;  %v1225_v24 = vmul.f32 %v1209_v0, %v2026_v60  ;;  %v1259_v25 = vld [vmem:[#allocation2 + $0x19a] sm:$0xff]  ;;  %v1260_v34 = vld [vmem:[#allocation2 + $0x1a2] sm:$0xff] }
  0xfc   : > { %v1288_v35 = vadd.f32 %v1272_v63, %v1240_v59  ;;  %v1193_v32 = vadd.f32 %v1177_v33, %v1142_v11  ;;  %v886_v49 = vmul.f32 %v1160_v23, %v2008_v42  ;;  %v1273_v39 = vmul.f32 %v1257_v17, %v2029_v2 }
  0xfd   : > { %v1095_v40 = vadd.f32 %v1079_v13, %v1047_v30  ;;  %v1127_v31 = vmul.f32 %v1256_v53, %v2020_v55  ;;  %v997_v50 = vadd.f32 %v981_v22, %v949_v21  ;;  %v1178_v8 = vmul.f32 %v1162_v1, %v2022_v57 }
  0xfe   : > { %1466 = vst.msk [vmem:[%s2089_s24 + $0xd8] sm:$0xff] %vm242_vm0, %v1288_v35  ;;  %v1241_v28 = vadd.f32 %v1225_v24, %v1193_v32  ;;  %v902_v48 = vadd.f32 %v2333_v56, %v886_v49  ;;  %v934_v38 = vmul.f32 %v1208_v3, %v2010_v43  ;;  %v1226_v42 = vmul.f32 %v1210_v5, %v2026_v60  ;;  %v1211_v43 = vld [vmem:[#allocation2 + $0x199] sm:$0xff] }
  0xff   : > { %v1143_v29 = vadd.f32 %v1127_v31, %v1095_v40  ;;  %v1048_v23 = vadd.f32 %v1032_v16, %v997_v50  ;;  %v1080_v41 = vmul.f32 %v1209_v0, %v2018_v52  ;;  %v982_v26 = vmul.f32 %v1256_v53, %v2012_v44 }
 0x100   : > { %v1289_v54 = vadd.f32 %v1273_v39, %v1241_v28  ;;  %v950_v18 = vadd.f32 %v934_v38, %v902_v48  ;;  %v1033_v14 = vmul.f32 %v1162_v1, %v2016_v51  ;;  %v1128_v45 = vmul.f32 %v1257_v17, %v2020_v55 }
 0x101   : > { %v1194_v37 = vadd.f32 %v1178_v8, %v1143_v29  ;;  %v1096_v4 = vadd.f32 %v1080_v41, %v1048_v23  ;;  %v1179_v56 = vmul.f32 %v1163_v19, %v2022_v57  ;;  %v1274_v10 = vmul.f32 %v1258_v47, %v2029_v2 }
 0x102   : > { %1467 = vst.msk [vmem:[%s2089_s24 + $0xe0] sm:$0xff] %vm242_vm0, %v1289_v54  ;;  %v998_v3 = vadd.f32 %v982_v26, %v950_v18  ;;  %v1081_v51 = vmul.f32 %v1210_v5, %v2018_v52  ;;  %v1227_v9 = vmul.f32 %v1211_v43, %v2026_v60  ;;  %v1129_v12 = vmul.f32 %v1258_v47, %v2020_v55  ;;  %v1212_v52 = vld [vmem:[#allocation2 + $0x1a1] sm:$0xff] }
 0x103   : > { %v1242_v6 = vadd.f32 %v1226_v42, %v1194_v37  ;;  %v1144_v15 = vadd.f32 %v1128_v45, %v1096_v4  ;;  %v1180_v63 = vmul.f32 %v1164_v62, %v2022_v57  ;;  %v1275_v46 = vmul.f32 %v1259_v25, %v2029_v2 }
 0x104   : > { %v1049_v44 = vadd.f32 %v1033_v14, %v998_v3  ;;  %v1228_v20 = vmul.f32 %v1212_v52, %v2026_v60  ;;  %v1276_v57 = vmul.f32 %v1260_v34, %v2029_v2 }
 0x105   : > { %v1290_v53 = vadd.f32 %v1274_v10, %v1242_v6  ;;  %v1195_v7 = vadd.f32 %v1179_v56, %v1144_v15 }
 0x106   : > { %v1097_v58 = vadd.f32 %v1081_v51, %v1049_v44 }
 0x107   : > { %1468 = vst.msk [vmem:[%s2089_s24 + $0xe8] sm:$0xff] %vm242_vm0, %v1290_v53  ;;  %v1243_v61 = vadd.f32 %v1227_v9, %v1195_v7 }
 0x108   : > { %v1145_v0 = vadd.f32 %v1129_v12, %v1097_v58 }
 0x109   : > { %v1291_v27 = vadd.f32 %v1275_v46, %v1243_v61 }
 0x10a   : > { %v1196_v36 = vadd.f32 %v1180_v63, %v1145_v0 }
 0x10b   : > { %1469 = vst.msk [vmem:[%s2089_s24 + $0xf0] sm:$0xff] %vm242_vm0, %v1291_v27 }
 0x10c   : > { %v1244_v55 = vadd.f32 %v1228_v20, %v1196_v36 }
 0x10e   : > { %v1292_v59 = vadd.f32 %v1276_v57, %v1244_v55 }
 0x110   : > { %1470 = vst.msk [vmem:[%s2089_s24 + $0xf8] sm:$0xff] %vm242_vm0, %v1292_v59 }
 0x111   : > { %1630 = shalt.err (!%p1627_p5)
}
 0x112   : > { %s1631_s4 = scalar_lea.hbm %s2447_s8, 4096  ;;  %s1635_s22 = scalar_lea.hbm %s2503_s3, 8192 }
 0x113   : > { %p1632_p9 = scmp.ne.s32.totalorder %s2447_s8, %s1631_s4  ;;  %p1636_p3 = scmp.lt.u32.totalorder %s2447_s8, %s2503_s3 }
 0x114   : > { %p1637_p7 = scmp.lt.u32.totalorder %s1635_s22, %s1631_s4  ;;  %p1639_p4 = scmp.lt.u32.totalorder %s1631_s4, %s2447_s8 }
 0x115   : > { %p1633_p1 = pnand %p1632_p9, %p1831_p10 }
 0x116   : > { %p1638_p13 = por %p1637_p7, %p1636_p3 }
 0x117   : > { %p1634_p2 = pneg %p1633_p1 }
 0x118   : > { %p1640_p6 = por %p1639_p4, %p1638_p13 }
 0x11a   : > { %p1641_p8 = pnand %p1640_p6, %p1634_p2 }
 0x11c   : > { %1644 = shalt.err (!%p1641_p8)
}
 0x11d   : > { %s1713_s10 = smov 128   ;;  %s1714_s11 = smov 8  }
 0x11e   : > { %1484 = dma.vmem_to_hbm [thread:$0]  (%p1831_p10), %s2449_s18, 4096, %s2447_s8, %s1312_s15, %s1713_s10, %s1713_s10, %s1714_s11  }
 0x11f PF: > { %s1341_s26 = sand.u32 1, %s1683_s12   ;;  %p2521_p12 = scmp.ne.s32.totalorder %s2511_s23, 0 }
 0x120   : > { %p2522_p11 = scmp.ge.s32.totalorder %s1703_s17, 2  ;;  %s1342_s7 = scalar_lea.sflag [#allocation5], %s1341_s26 }
 0x122   : > { %p1495_p0 = pnand %p2522_p11, %p2521_p12 }
 0x124   : > { %1678 = dma.done.wait (!%p1495_p0), %s1342_s7, 4096  }
 0x125   : > { %1680 = vsyncadd (!%p1495_p0), %s1342_s7, 4294963200  ;;  %s20_s17 = sadd.s32 1, %s1703_s17   ;;  %s2523_s12 = smov %s1687_s13 }
 0x126   : > { %p17_p5 = scmp.ge.s32.totalorder %s20_s17, 4   ;;  %s2524_s13 = smov %s1691_s14 }
 0x127   : > { %s2525_s14 = smov %s1840_s5  ;;  %s2526_s15 = smov %s1699_s16 }
 0x128   : > { %s2527_s16 = smov %s2529_s28  ;;  %19 = sbr.rel (!%p17_p5) target bundleno = 7 (0x7), region = 95 }
 0x12f   :  { %1347 = vsyncpa [#allocation4], 1 }
 0x130   :  { %1349 = vsyncpa [#allocation4 + $0x1], 1 }
 0x131   :  { %1350 = vsyncpa [#allocation7], 1 }
 0x132   :  { %1351 = vsyncpa [#allocation5], 1 }
 0x133   :  { %1353 = vsyncpa [#allocation5 + $0x1], 1 }

</bundles_post_ra>
